<compile_context>
chip_gen: v7x
topology: tpu7x:2x2x1
jax: 0.10.0
libtpu: 0.0.40
codegen_flags: <defaults>
</compile_context>

<pallas_src>
import functools

import jax
import jax.numpy as jnp
from jax import lax
from jax.experimental import pallas as pl
from jax.experimental.pallas import tpu as pltpu

FINAL_BIAS_INIT = 0.0003
FINAL_WEIGHT_INIT = 0.003
LN_EPS = 1e-5  # nn.LayerNorm default


def _layernorm_fused(h, gamma, beta):
    """LayerNorm with fused statistics: var = E[h^2] - E[h]^2 (two independent
    cross-lane reduces; avoids serializing the second reduce behind a full-tile
    subtract)."""
    n = h.shape[-1]
    s1 = jnp.sum(h, axis=-1, keepdims=True)
    s2 = jnp.sum(h * h, axis=-1, keepdims=True)
    mu = s1 * (1.0 / n)
    var = jnp.maximum(s2 * (1.0 / n) - mu * mu, 0.0)
    return (h - mu) * lax.rsqrt(var + LN_EPS) * gamma + beta


def _layernorm_ref(h, gamma, beta):
    """Two-pass (textbook / PyTorch) LayerNorm for the pure-JAX reference."""
    mu = jnp.mean(h, axis=-1, keepdims=True)
    d = h - mu
    var = jnp.mean(d * d, axis=-1, keepdims=True)
    return d * lax.rsqrt(var + LN_EPS) * gamma + beta


def critic_kernel(x_ref, a_ref,
                  w1_ref, b1_ref, g1_ref, be1_ref,
                  w2x_ref, w2a_ref, b2_ref, g2_ref, be2_ref,
                  wv_ref, bv_ref,
                  o_ref, *, chunk_b, n_chunks, mm_dtype):
    # Hoist small grid-invariant parameter reads (one load/broadcast each).
    w1 = w1_ref[...]          # (num_inputs, h1)   mm_dtype
    w2x = w2x_ref[...]        # (h1, h2)           mm_dtype
    w2a = w2a_ref[...]        # (action_dim, h2)   mm_dtype
    b1 = b1_ref[...]
    g1 = g1_ref[...]
    be1 = be1_ref[...]
    b2 = b2_ref[...]
    g2 = g2_ref[...]
    be2 = be2_ref[...]
    wv = wv_ref[...]          # (1, h2)  f32
    bv = bv_ref[...]          # (1, 1)   f32

    @pl.loop(0, n_chunks)
    def _(c):
        off = pl.multiple_of(c * chunk_b, chunk_b)
        x = x_ref[pl.ds(off, chunk_b), :]     # (C, num_inputs)  f32
        a = a_ref[pl.ds(off, chunk_b), :]     # (C, action_dim)  f32

        # linear1 (MXU, f32 accumulate) -> LayerNorm (f32) -> ReLU.
        # Activation casts happen here (VPU, co-issues); no-ops on the f32 path.
        h = jnp.dot(x.astype(mm_dtype), w1,
                    preferred_element_type=jnp.float32) + b1
        h = _layernorm_fused(h, g1, be1)
        h = jnp.maximum(h, 0.0)

        # cat([h, a]) @ W2 == h @ W2x + a @ W2a  -> LayerNorm -> ReLU
        h2 = (jnp.dot(h.astype(mm_dtype), w2x,
                      preferred_element_type=jnp.float32)
              + jnp.dot(a.astype(mm_dtype), w2a,
                        preferred_element_type=jnp.float32)
              + b2)
        h2 = _layernorm_fused(h2, g2, be2)
        h2 = jnp.maximum(h2, 0.0)

        # Value head as one MXU contraction that lands lane-dense:
        # (1, h2) . (C, h2)^T -> (1, C).  No sublane->lane repack.
        v = lax.dot_general(wv, h2, (((1,), (1,)), ((), ())),
                            preferred_element_type=jnp.float32) + bv
        o_ref[:, pl.ds(off, chunk_b)] = v.astype(o_ref.dtype)


def _multi_core_chip():
    """True on chips where one jax device spans 2 TensorCores (v7x / v4
    megacore) and grid-level 'parallel' sharding can pay off."""
    try:
        kind = jax.devices()[0].device_kind.lower()
    except Exception:
        return False
    return ("v7" in kind) or ("7x" in kind) or ("v4" in kind)


def _choose_tiling(B, *, multi_core, max_chunk=256):
    """Return (tile_b, chunk_b): tile_b = rows per grid step (DMA block);
    chunk_b = rows per in-kernel sub-chunk (vreg live-range bound)."""
    # Single grid step unless a 2-TC chip has enough batch to amortize the
    # ~0.35 us per-step overhead across both cores.
    if multi_core and B >= 1024 and B % 256 == 0:
        tile_b = B // 2
    else:
        tile_b = B
    # In-kernel chunk: (chunk_b, 64) f32 intermediates must stay well inside
    # the 64-vreg file (256 rows -> 16 vregs for h2).
    if tile_b <= max_chunk:
        chunk_b = tile_b
    elif tile_b % max_chunk == 0:
        chunk_b = max_chunk
    elif tile_b % 128 == 0:
        chunk_b = 128
    else:
        chunk_b = tile_b
    return tile_b, chunk_b


def critic_forward(inputs, actions, params, *, compute_dtype=jnp.float32,
                   tile_b=None, chunk_b=None):
    B, num_inputs = inputs.shape
    action_dim = actions.shape[1]
    w1, b1, g1, be1, w2x, w2a, b2, g2, be2, wv, bv = params
    h1 = w1.shape[1]
    h2 = w2x.shape[1]

    multi_core = _multi_core_chip()
    auto_tile_b, auto_chunk_b = _choose_tiling(B, multi_core=multi_core)
    if tile_b is None:
        tile_b = auto_tile_b
    if chunk_b is None:
        chunk_b = auto_chunk_b if tile_b == auto_tile_b else min(tile_b, 256)
    assert B % tile_b == 0, "batch must be divisible by tile_b"
    assert tile_b % chunk_b == 0, "tile_b must be divisible by chunk_b"
    n_chunks = tile_b // chunk_b
    grid = (B // tile_b,)

    # bf16 only on the tiny grid-invariant weights (a few KB); activations stay
    # f32 in HBM and are cast in-kernel right before the dots.
    w1c = w1.astype(compute_dtype)
    w2xc = w2x.astype(compute_dtype)
    w2ac = w2a.astype(compute_dtype)

    bcast = lambda i: (0, 0)
    w_bytes = jnp.dtype(compute_dtype).itemsize

    cost = pl.CostEstimate(
        flops=2 * B * (num_inputs * h1 + (h1 + action_dim) * h2 + h2),
        transcendentals=2 * B,  # two rsqrt per row (the LayerNorms)
        bytes_accessed=(B * (num_inputs + action_dim) * 4      # f32 activations
                        + B * 4                                  # output
                        + (num_inputs * h1 + h1 * h2 + action_dim * h2) * w_bytes
                        + (4 * h1 + 4 * h2 + 2) * 4),            # small params
    )

    kernel = functools.partial(critic_kernel, chunk_b=chunk_b,
                               n_chunks=n_chunks, mm_dtype=compute_dtype)

    out = pl.pallas_call(
        kernel,
        out_shape=jax.ShapeDtypeStruct((1, B), jnp.float32),
        grid_spec=pltpu.PrefetchScalarGridSpec(
            num_scalar_prefetch=0,
            grid=grid,
            in_specs=[
                pl.BlockSpec((tile_b, num_inputs), lambda i: (i, 0)),
                pl.BlockSpec((tile_b, action_dim), lambda i: (i, 0)),
                # Grid-invariant weights / biases / LN params (DMA'd once).
                pl.BlockSpec((num_inputs, h1), bcast),
                pl.BlockSpec((1, h1), bcast),
                pl.BlockSpec((1, h1), bcast),
                pl.BlockSpec((1, h1), bcast),
                pl.BlockSpec((h1, h2), bcast),
                pl.BlockSpec((action_dim, h2), bcast),
                pl.BlockSpec((1, h2), bcast),
                pl.BlockSpec((1, h2), bcast),
                pl.BlockSpec((1, h2), bcast),
                pl.BlockSpec((1, h2), bcast),   # wv stored as (1, h2)
                pl.BlockSpec((1, 1), bcast),
            ],
            # Lane-dense output: one (1, tile_b) row per grid step.
            out_specs=pl.BlockSpec((1, tile_b), lambda i: (0, i)),
        ),
        compiler_params=pltpu.CompilerParams(
            dimension_semantics=("parallel",)),
        cost_estimate=cost,
    )(inputs, actions, w1c, b1, g1, be1, w2xc, w2ac, b2, g2, be2, wv, bv)

    return out.reshape(B, 1)


def init_params(key, num_inputs, hidden_size, action_dim):
    """Deterministic fan-in uniform init matching Critic.initialize_weights()."""
    h1, h2 = hidden_size
    ks = jax.random.split(key, 6)
    f32 = jnp.float32

    w1_bound = 1.0 / jnp.sqrt(jnp.array(num_inputs, f32))
    w1 = jax.random.uniform(ks[0], (num_inputs, h1), f32, -w1_bound, w1_bound)
    b1 = jax.random.uniform(ks[1], (1, h1), f32, -w1_bound, w1_bound)

    fan_in2 = h1 + action_dim
    w2_bound = 1.0 / jnp.sqrt(jnp.array(fan_in2, f32))
    w2_full = jax.random.uniform(ks[2], (fan_in2, h2), f32, -w2_bound, w2_bound)
    w2x, w2a = w2_full[:h1], w2_full[h1:]
    b2 = jax.random.uniform(ks[3], (1, h2), f32, -w2_bound, w2_bound)

    wv = jax.random.uniform(ks[4], (1, h2), f32,
                            -FINAL_WEIGHT_INIT, FINAL_WEIGHT_INIT)
    bv = jax.random.uniform(ks[5], (1, 1), f32,
                            -FINAL_BIAS_INIT, FINAL_BIAS_INIT)

    # LayerNorm affine params (PyTorch default: weight=1, bias=0)
    g1, be1 = jnp.ones((1, h1), f32), jnp.zeros((1, h1), f32)
    g2, be2 = jnp.ones((1, h2), f32), jnp.zeros((1, h2), f32)

    return (w1, b1, g1, be1, w2x, w2a, b2, g2, be2, wv, bv)


def critic_reference(inputs, actions, params):
    """Pure-JAX reference of the PyTorch forward, for verification."""
    w1, b1, g1, be1, w2x, w2a, b2, g2, be2, wv, bv = params
    x = inputs @ w1 + b1
    x = _layernorm_ref(x, g1, be1)
    x = jnp.maximum(x, 0.0)
    x = jnp.concatenate([x, actions], axis=1)
    w2 = jnp.concatenate([w2x, w2a], axis=0)
    x = x @ w2 + b2
    x = _layernorm_ref(x, g2, be2)
    x = jnp.maximum(x, 0.0)
    return x @ wv.T + bv


if __name__ == "__main__":
    key = jax.random.PRNGKey(0)
    k_in, k_act, k_par = jax.random.split(key, 3)

    B = 256                      # small demo batch
    num_inputs = 16
    hidden_size = [32, 64]
    action_dim = 4

    inputs = jax.random.normal(k_in, (B, num_inputs), jnp.float32)
    actions = jax.random.normal(k_act, (B, action_dim), jnp.float32)
    params = init_params(k_par, num_inputs, hidden_size, action_dim)

    ref = critic_reference(inputs, actions, params)

    # f32 path: must match the pure-JAX reference tightly (fused-LN form only
    # differs from the two-pass reference at the ~1e-6 level here).
    out = critic_forward(inputs, actions, params, compute_dtype=jnp.float32)
    out = jax.block_until_ready(out)
    assert out.shape == (B, 1)
    assert jnp.allclose(out, ref, atol=1e-4, rtol=1e-4)

    # bf16 matmul-weight path (v6e/v7x): loose check (LN stats see bf16 dots).
    out_bf16 = critic_forward(inputs, actions, params,
                              compute_dtype=jnp.bfloat16)
    out_bf16 = jax.block_until_ready(out_bf16)
    assert out_bf16.shape == (B, 1)
    assert jnp.allclose(out_bf16, ref, atol=5e-2, rtol=5e-2)

    print("KERNEL_OK")
</pallas_src>

<mosaic_0001>
module attributes {stable_mosaic.version = 11 : i64} {
  func.func @critic_kernel(%arg0: i32, %arg1: memref<256x16xf32, #tpu.memory_space<vmem>>, %arg2: memref<256x4xf32, #tpu.memory_space<vmem>>, %arg3: memref<16x32xf32, #tpu.memory_space<vmem>>, %arg4: memref<1x32xf32, #tpu.memory_space<vmem>>, %arg5: memref<1x32xf32, #tpu.memory_space<vmem>>, %arg6: memref<1x32xf32, #tpu.memory_space<vmem>>, %arg7: memref<32x64xf32, #tpu.memory_space<vmem>>, %arg8: memref<4x64xf32, #tpu.memory_space<vmem>>, %arg9: memref<1x64xf32, #tpu.memory_space<vmem>>, %arg10: memref<1x64xf32, #tpu.memory_space<vmem>>, %arg11: memref<1x64xf32, #tpu.memory_space<vmem>>, %arg12: memref<1x64xf32, #tpu.memory_space<vmem>>, %arg13: memref<1x1xf32, #tpu.memory_space<vmem>>, %arg14: memref<1x256xf32, #tpu.memory_space<vmem>>) attributes {dimension_semantics = [#tpu.dimension_semantics<parallel>], iteration_bounds = array<i64: 1>, scalar_prefetch = 0 : i64, scratch_operands = 0 : i64, tpu.core_type = #tpu.core_type<tc>, window_params = [{transform_indices = @transform_0, window_bounds = array<i64: 256, 16>}, {transform_indices = @transform_1, window_bounds = array<i64: 256, 4>}, {pipeline_mode = #tpu.pipeline_mode<synchronous>, transform_indices = @transform_2, window_bounds = array<i64: 16, 32>}, {pipeline_mode = #tpu.pipeline_mode<synchronous>, transform_indices = @transform_3, window_bounds = array<i64: 1, 32>}, {pipeline_mode = #tpu.pipeline_mode<synchronous>, transform_indices = @transform_4, window_bounds = array<i64: 1, 32>}, {pipeline_mode = #tpu.pipeline_mode<synchronous>, transform_indices = @transform_5, window_bounds = array<i64: 1, 32>}, {pipeline_mode = #tpu.pipeline_mode<synchronous>, transform_indices = @transform_6, window_bounds = array<i64: 32, 64>}, {pipeline_mode = #tpu.pipeline_mode<synchronous>, transform_indices = @transform_7, window_bounds = array<i64: 4, 64>}, {pipeline_mode = #tpu.pipeline_mode<synchronous>, transform_indices = @transform_8, window_bounds = array<i64: 1, 64>}, {pipeline_mode = #tpu.pipeline_mode<synchronous>, transform_indices = @transform_9, window_bounds = array<i64: 1, 64>}, {pipeline_mode = #tpu.pipeline_mode<synchronous>, transform_indices = @transform_10, window_bounds = array<i64: 1, 64>}, {pipeline_mode = #tpu.pipeline_mode<synchronous>, transform_indices = @transform_11, window_bounds = array<i64: 1, 64>}, {pipeline_mode = #tpu.pipeline_mode<synchronous>, transform_indices = @transform_12, window_bounds = array<i64: 1, 1>}, {transform_indices = @transform_13, window_bounds = array<i64: 1, 256>}]} {
    %c0 = arith.constant 0 : index
    %c0_0 = arith.constant 0 : index
    %0 = vector.load %arg3[%c0, %c0_0] : memref<16x32xf32, #tpu.memory_space<vmem>>, vector<16x32xf32>
    %c0_1 = arith.constant 0 : index
    %c0_2 = arith.constant 0 : index
    %1 = vector.load %arg7[%c0_1, %c0_2] : memref<32x64xf32, #tpu.memory_space<vmem>>, vector<32x64xf32>
    %c0_3 = arith.constant 0 : index
    %c0_4 = arith.constant 0 : index
    %2 = vector.load %arg8[%c0_3, %c0_4] : memref<4x64xf32, #tpu.memory_space<vmem>>, vector<4x64xf32>
    %c0_5 = arith.constant 0 : index
    %c0_6 = arith.constant 0 : index
    %3 = vector.load %arg4[%c0_5, %c0_6] : memref<1x32xf32, #tpu.memory_space<vmem>>, vector<1x32xf32>
    %c0_7 = arith.constant 0 : index
    %c0_8 = arith.constant 0 : index
    %4 = vector.load %arg5[%c0_7, %c0_8] : memref<1x32xf32, #tpu.memory_space<vmem>>, vector<1x32xf32>
    %c0_9 = arith.constant 0 : index
    %c0_10 = arith.constant 0 : index
    %5 = vector.load %arg6[%c0_9, %c0_10] : memref<1x32xf32, #tpu.memory_space<vmem>>, vector<1x32xf32>
    %c0_11 = arith.constant 0 : index
    %c0_12 = arith.constant 0 : index
    %6 = vector.load %arg9[%c0_11, %c0_12] : memref<1x64xf32, #tpu.memory_space<vmem>>, vector<1x64xf32>
    %c0_13 = arith.constant 0 : index
    %c0_14 = arith.constant 0 : index
    %7 = vector.load %arg10[%c0_13, %c0_14] : memref<1x64xf32, #tpu.memory_space<vmem>>, vector<1x64xf32>
    %c0_15 = arith.constant 0 : index
    %c0_16 = arith.constant 0 : index
    %8 = vector.load %arg11[%c0_15, %c0_16] : memref<1x64xf32, #tpu.memory_space<vmem>>, vector<1x64xf32>
    %c0_17 = arith.constant 0 : index
    %c0_18 = arith.constant 0 : index
    %9 = vector.load %arg12[%c0_17, %c0_18] : memref<1x64xf32, #tpu.memory_space<vmem>>, vector<1x64xf32>
    %c0_19 = arith.constant 0 : index
    %c0_20 = arith.constant 0 : index
    %10 = vector.load %arg13[%c0_19, %c0_20] : memref<1x1xf32, #tpu.memory_space<vmem>>, vector<1x1xf32>
    %c0_i32 = arith.constant 0 : i32
    %c1_i32 = arith.constant 1 : i32
    %11 = arith.muli %c0_i32, %c1_i32 : i32
    %c0_i32_21 = arith.constant 0 : i32
    %12 = arith.addi %c0_i32_21, %11 : i32
    %c256_i32 = arith.constant 256 : i32
    %13 = arith.muli %12, %c256_i32 : i32
    %14 = tpu.assume_multiple %13, 256 : i32
    %15 = arith.index_cast %14 : i32 to index
    %c0_22 = arith.constant 0 : index
    %16 = vector.load %arg1[%15, %c0_22] : memref<256x16xf32, #tpu.memory_space<vmem>>, vector<256x16xf32>
    %17 = arith.index_cast %14 : i32 to index
    %c0_23 = arith.constant 0 : index
    %18 = vector.load %arg2[%17, %c0_23] : memref<256x4xf32, #tpu.memory_space<vmem>>, vector<256x4xf32>
    %cst = arith.constant dense<0.000000e+00> : vector<256x32xf32>
    %19 = tpu.matmul %16, %0, %cst {dimension_numbers = #tpu.dot_dimension_numbers<[1], [0], [0], [1], [0, 0, 1, 1], [], []>} : vector<256x16xf32>, vector<16x32xf32>, vector<256x32xf32> -> vector<256x32xf32>
    %20 = vector.broadcast %3 : vector<1x32xf32> to vector<256x32xf32>
    %21 = arith.addf %19, %20 : vector<256x32xf32>
    %cst_24 = arith.constant dense<0.000000e+00> : vector<256xf32>
    %22 = vector.multi_reduction <add>, %21, %cst_24 [1] : vector<256x32xf32> to vector<256xf32>
    %23 = vector.shape_cast %22 : vector<256xf32> to vector<256x1xf32>
    %24 = arith.mulf %21, %21 : vector<256x32xf32>
    %cst_25 = arith.constant dense<0.000000e+00> : vector<256xf32>
    %25 = vector.multi_reduction <add>, %24, %cst_25 [1] : vector<256x32xf32> to vector<256xf32>
    %26 = vector.shape_cast %25 : vector<256xf32> to vector<256x1xf32>
    %cst_26 = arith.constant 3.125000e-02 : f32
    %27 = vector.broadcast %cst_26 : f32 to vector<256x1xf32>
    %28 = arith.mulf %23, %27 : vector<256x1xf32>
    %cst_27 = arith.constant 3.125000e-02 : f32
    %29 = vector.broadcast %cst_27 : f32 to vector<256x1xf32>
    %30 = arith.mulf %26, %29 : vector<256x1xf32>
    %31 = arith.mulf %28, %28 : vector<256x1xf32>
    %32 = arith.subf %30, %31 : vector<256x1xf32>
    %cst_28 = arith.constant 0.000000e+00 : f32
    %33 = vector.broadcast %cst_28 : f32 to vector<256x1xf32>
    %34 = arith.maximumf %32, %33 : vector<256x1xf32>
    %35 = vector.broadcast %28 : vector<256x1xf32> to vector<256x32xf32>
    %36 = arith.subf %21, %35 : vector<256x32xf32>
    %cst_29 = arith.constant 9.99999974E-6 : f32
    %37 = vector.broadcast %cst_29 : f32 to vector<256x1xf32>
    %38 = arith.addf %34, %37 : vector<256x1xf32>
    %39 = math.rsqrt %38 : vector<256x1xf32>
    %40 = vector.broadcast %39 : vector<256x1xf32> to vector<256x32xf32>
    %41 = arith.mulf %36, %40 : vector<256x32xf32>
    %42 = vector.broadcast %4 : vector<1x32xf32> to vector<256x32xf32>
    %43 = arith.mulf %41, %42 : vector<256x32xf32>
    %44 = vector.broadcast %5 : vector<1x32xf32> to vector<256x32xf32>
    %45 = arith.addf %43, %44 : vector<256x32xf32>
    %cst_30 = arith.constant 0.000000e+00 : f32
    %46 = vector.broadcast %cst_30 : f32 to vector<256x32xf32>
    %47 = arith.maximumf %45, %46 : vector<256x32xf32>
    %cst_31 = arith.constant dense<0.000000e+00> : vector<256x64xf32>
    %48 = tpu.matmul %47, %1, %cst_31 {dimension_numbers = #tpu.dot_dimension_numbers<[1], [0], [0], [1], [0, 0, 1, 1], [], []>} : vector<256x32xf32>, vector<32x64xf32>, vector<256x64xf32> -> vector<256x64xf32>
    %cst_32 = arith.constant dense<0.000000e+00> : vector<256x64xf32>
    %49 = tpu.matmul %18, %2, %cst_32 {dimension_numbers = #tpu.dot_dimension_numbers<[1], [0], [0], [1], [0, 0, 1, 1], [], []>} : vector<256x4xf32>, vector<4x64xf32>, vector<256x64xf32> -> vector<256x64xf32>
    %50 = arith.addf %48, %49 : vector<256x64xf32>
    %51 = vector.broadcast %6 : vector<1x64xf32> to vector<256x64xf32>
    %52 = arith.addf %50, %51 : vector<256x64xf32>
    %cst_33 = arith.constant dense<0.000000e+00> : vector<256xf32>
    %53 = vector.multi_reduction <add>, %52, %cst_33 [1] : vector<256x64xf32> to vector<256xf32>
    %54 = vector.shape_cast %53 : vector<256xf32> to vector<256x1xf32>
    %55 = arith.mulf %52, %52 : vector<256x64xf32>
    %cst_34 = arith.constant dense<0.000000e+00> : vector<256xf32>
    %56 = vector.multi_reduction <add>, %55, %cst_34 [1] : vector<256x64xf32> to vector<256xf32>
    %57 = vector.shape_cast %56 : vector<256xf32> to vector<256x1xf32>
    %cst_35 = arith.constant 1.562500e-02 : f32
    %58 = vector.broadcast %cst_35 : f32 to vector<256x1xf32>
    %59 = arith.mulf %54, %58 : vector<256x1xf32>
    %cst_36 = arith.constant 1.562500e-02 : f32
    %60 = vector.broadcast %cst_36 : f32 to vector<256x1xf32>
    %61 = arith.mulf %57, %60 : vector<256x1xf32>
    %62 = arith.mulf %59, %59 : vector<256x1xf32>
    %63 = arith.subf %61, %62 : vector<256x1xf32>
    %cst_37 = arith.constant 0.000000e+00 : f32
    %64 = vector.broadcast %cst_37 : f32 to vector<256x1xf32>
    %65 = arith.maximumf %63, %64 : vector<256x1xf32>
    %66 = vector.broadcast %59 : vector<256x1xf32> to vector<256x64xf32>
    %67 = arith.subf %52, %66 : vector<256x64xf32>
    %cst_38 = arith.constant 9.99999974E-6 : f32
    %68 = vector.broadcast %cst_38 : f32 to vector<256x1xf32>
    %69 = arith.addf %65, %68 : vector<256x1xf32>
    %70 = math.rsqrt %69 : vector<256x1xf32>
    %71 = vector.broadcast %70 : vector<256x1xf32> to vector<256x64xf32>
    %72 = arith.mulf %67, %71 : vector<256x64xf32>
    %73 = vector.broadcast %7 : vector<1x64xf32> to vector<256x64xf32>
    %74 = arith.mulf %72, %73 : vector<256x64xf32>
    %75 = vector.broadcast %8 : vector<1x64xf32> to vector<256x64xf32>
    %76 = arith.addf %74, %75 : vector<256x64xf32>
    %cst_39 = arith.constant 0.000000e+00 : f32
    %77 = vector.broadcast %cst_39 : f32 to vector<256x64xf32>
    %78 = arith.maximumf %76, %77 : vector<256x64xf32>
    %cst_40 = arith.constant dense<0.000000e+00> : vector<1x256xf32>
    %79 = tpu.matmul %9, %78, %cst_40 {dimension_numbers = #tpu.dot_dimension_numbers<[1], [1], [0], [0], [0, 0, 1, 0], [], []>} : vector<1x64xf32>, vector<256x64xf32>, vector<1x256xf32> -> vector<1x256xf32>
    %80 = vector.broadcast %10 : vector<1x1xf32> to vector<1x256xf32>
    %81 = arith.addf %79, %80 : vector<1x256xf32>
    %c0_41 = arith.constant 0 : index
    %82 = arith.index_cast %14 : i32 to index
    %83 = vector.load %arg14[%c0_41, %82] : memref<1x256xf32, #tpu.memory_space<vmem>>, vector<1x256xf32>
    tpu.vector_store %arg14[%c0_41, %82], %81 {strides = array<i32>} : memref<1x256xf32, #tpu.memory_space<vmem>>, vector<1x256xf32>,
    %c1_i32_42 = arith.constant 1 : i32
    return
  }
  func.func @transform_0(%arg0: i32) -> (i32, i32) {
    %c0_i32 = arith.constant 0 : i32
    %c0_i32_0 = arith.constant 0 : i32
    return %arg0, %c0_i32 : i32, i32
  }
  func.func @transform_1(%arg0: i32) -> (i32, i32) {
    %c0_i32 = arith.constant 0 : i32
    %c0_i32_0 = arith.constant 0 : i32
    return %arg0, %c0_i32 : i32, i32
  }
  func.func @transform_2(%arg0: i32) -> (i32, i32) {
    %c0_i32 = arith.constant 0 : i32
    %c0_i32_0 = arith.constant 0 : i32
    %c0_i32_1 = arith.constant 0 : i32
    return %c0_i32, %c0_i32_0 : i32, i32
  }
  func.func @transform_3(%arg0: i32) -> (i32, i32) {
    %c0_i32 = arith.constant 0 : i32
    %c0_i32_0 = arith.constant 0 : i32
    %c0_i32_1 = arith.constant 0 : i32
    return %c0_i32, %c0_i32_0 : i32, i32
  }
  func.func @transform_4(%arg0: i32) -> (i32, i32) {
    %c0_i32 = arith.constant 0 : i32
    %c0_i32_0 = arith.constant 0 : i32
    %c0_i32_1 = arith.constant 0 : i32
    return %c0_i32, %c0_i32_0 : i32, i32
  }
  func.func @transform_5(%arg0: i32) -> (i32, i32) {
    %c0_i32 = arith.constant 0 : i32
    %c0_i32_0 = arith.constant 0 : i32
    %c0_i32_1 = arith.constant 0 : i32
    return %c0_i32, %c0_i32_0 : i32, i32
  }
  func.func @transform_6(%arg0: i32) -> (i32, i32) {
    %c0_i32 = arith.constant 0 : i32
    %c0_i32_0 = arith.constant 0 : i32
    %c0_i32_1 = arith.constant 0 : i32
    return %c0_i32, %c0_i32_0 : i32, i32
  }
  func.func @transform_7(%arg0: i32) -> (i32, i32) {
    %c0_i32 = arith.constant 0 : i32
    %c0_i32_0 = arith.constant 0 : i32
    %c0_i32_1 = arith.constant 0 : i32
    return %c0_i32, %c0_i32_0 : i32, i32
  }
  func.func @transform_8(%arg0: i32) -> (i32, i32) {
    %c0_i32 = arith.constant 0 : i32
    %c0_i32_0 = arith.constant 0 : i32
    %c0_i32_1 = arith.constant 0 : i32
    return %c0_i32, %c0_i32_0 : i32, i32
  }
  func.func @transform_9(%arg0: i32) -> (i32, i32) {
    %c0_i32 = arith.constant 0 : i32
    %c0_i32_0 = arith.constant 0 : i32
    %c0_i32_1 = arith.constant 0 : i32
    return %c0_i32, %c0_i32_0 : i32, i32
  }
  func.func @transform_10(%arg0: i32) -> (i32, i32) {
    %c0_i32 = arith.constant 0 : i32
    %c0_i32_0 = arith.constant 0 : i32
    %c0_i32_1 = arith.constant 0 : i32
    return %c0_i32, %c0_i32_0 : i32, i32
  }
  func.func @transform_11(%arg0: i32) -> (i32, i32) {
    %c0_i32 = arith.constant 0 : i32
    %c0_i32_0 = arith.constant 0 : i32
    %c0_i32_1 = arith.constant 0 : i32
    return %c0_i32, %c0_i32_0 : i32, i32
  }
  func.func @transform_12(%arg0: i32) -> (i32, i32) {
    %c0_i32 = arith.constant 0 : i32
    %c0_i32_0 = arith.constant 0 : i32
    %c0_i32_1 = arith.constant 0 : i32
    return %c0_i32, %c0_i32_0 : i32, i32
  }
  func.func @transform_13(%arg0: i32) -> (i32, i32) {
    %c0_i32 = arith.constant 0 : i32
    %c0_i32_0 = arith.constant 0 : i32
    return %c0_i32, %arg0 : i32, i32
  }
}

</mosaic_0001>

<bundles_post_ra>
// kernel: tpu_custom_call.1
= control target key start
LH: loop header
LB: loop body
LE: loop exit
PB: predicated region body
PF: predicated region fallthrough
CT: control target
= control target key end

     0   :  { %s4870_s0 = inlined_call_operand.vmem [shape: f32[256,16], index: 0, kind: input, shape index: {}]   ;;  %s4871_s1 = inlined_call_operand.vmem [shape: f32[256,4], index: 1, kind: input, shape index: {}]   ;;  %s4872_s2 = inlined_call_operand.vmem [shape: f32[16,32], index: 2, kind: input, shape index: {}]   ;;  %s4873_s3 = inlined_call_operand.vmem [shape: f32[1,32], index: 3, kind: input, shape index: {}]   ;;  %s4874_s4 = inlined_call_operand.vmem [shape: f32[1,32], index: 4, kind: input, shape index: {}]   ;;  %s4875_s5 = inlined_call_operand.vmem [shape: f32[1,32], index: 5, kind: input, shape index: {}]   ;;  %s4876_s6 = inlined_call_operand.vmem [shape: f32[32,64], index: 6, kind: input, shape index: {}]   ;;  %s4877_s7 = inlined_call_operand.vmem [shape: f32[4,64], index: 7, kind: input, shape index: {}]   ;;  %s4878_s8 = inlined_call_operand.vmem [shape: f32[1,64], index: 8, kind: input, shape index: {}]   ;;  %s4879_s9 = inlined_call_operand.vmem [shape: f32[1,64], index: 9, kind: input, shape index: {}]   ;;  %s4880_s10 = inlined_call_operand.vmem [shape: f32[1,64], index: 10, kind: input, shape index: {}]   ;;  %s4881_s11 = inlined_call_operand.vmem [shape: f32[1,64], index: 11, kind: input, shape index: {}]   ;;  %s4882_s12 = inlined_call_operand.<no memory space> [shape: f32[1,1], index: 12, kind: input, shape index: {}]   ;;  %s4883_s13 = inlined_call_operand.hbm [shape: f32[1,256], index: 13, kind: output, shape index: {}]  }
   0x1   :  { %v18_v0 = vstv %s4882_s12 }
   0x2   :  { %19 = vst [vmem:[#allocation2] sm:$0x1] %v18_v0 }
   0x3   :  { %v47_v1 = vld [vmem:[%s4872_s2] sm:$0xff]  ;;  %v48_v2 = vld [vmem:[%s4872_s2 + $0x8] sm:$0xff]  ;;  %vm132_vm0 = vcmask 130048   ;;  %v64_v6 = vld [vmem:[%s4870_s0 + $0x10] sm:$0xff] }
   0x4   :  { %v62_v3 = vld [vmem:[%s4870_s0] sm:$0xff]  ;;  %v3028_v4 = vpack.c.bf16 %v48_v2, %v47_v1  ;;  %v63_v5 = vld [vmem:[%s4870_s0 + $0x8] sm:$0xff]  ;;  %v65_v7 = vld [vmem:[%s4870_s0 + $0x18] sm:$0xff] }
   0x5   :  { %2874 = vmatprep.mubr.msk.f32.mxu0 %vm132_vm0, %v62_v3  ;;  %v66_v8 = vld [vmem:[%s4870_s0 + $0x20] sm:$0xff] }
   0x6   :  { %3029 = vmatprep.subr.bf16.mxu0 %v3028_v4 }
   0x7   :  { %3031 = vmatpush3.bf16.msra.mxu0 %v3028_v4 }
   0xa   :  { %2875 = vmatmul.mubr.msk.f32.vlgmr.msra.gmra.mrb[0].mxu0 %vm132_vm0, %v63_v5 }
   0xb   :  { %2877 = vmatprep.mubr.msk.f32.mxu0 %vm132_vm0, %v64_v6 }
   0xe   :  { %2878 = vmatmul.mubr.msk.f32.gmra.mrb[2].mxu0 %vm132_vm0, %v65_v7 }
   0xf   :  { %20 = vsyncpa [#allocation4], 0  ;;  %2880 = vmatprep.mubr.msk.f32.mxu0 %vm132_vm0, %v66_v8  ;;  %v67_v9 = vld [vmem:[%s4870_s0 + $0x28] sm:$0xff]  ;;  %v68_v10 = vld [vmem:[%s4870_s0 + $0x30] sm:$0xff]  ;;  %vm1172_vm1 = vcmask 1043456   ;;  %vm1075_vm2 = vcmask 31744  }
  0x10   :  { %v69_v11 = vld [vmem:[%s4870_s0 + $0x38] sm:$0xff]  ;;  %v70_v12 = vld [vmem:[%s4870_s0 + $0x40] sm:$0xff]  ;;  %v71_v13 = vld [vmem:[%s4870_s0 + $0x48] sm:$0xff]  ;;  %vm454_vm3 = vcmask 261120   ;;  %vm1760_vm4 = vcmask 523264  }
  0x11   :  { %v72_v14 = vld [vmem:[%s4870_s0 + $0x50] sm:$0xff]  ;;  %v73_v15 = vld [vmem:[%s4870_s0 + $0x58] sm:$0xff]  ;;  %v74_v16 = vld [vmem:[%s4870_s0 + $0x60] sm:$0xff] }
  0x12   :  { %2881 = vmatmul.mubr.msk.f32.gmra.mrb[4].mxu0 %vm132_vm0, %v67_v9  ;;  %v75_v17 = vld [vmem:[%s4870_s0 + $0x68] sm:$0xff]  ;;  %v76_v18 = vld [vmem:[%s4870_s0 + $0x70] sm:$0xff]  ;;  %v77_v19 = vld [vmem:[%s4870_s0 + $0x78] sm:$0xff] }
  0x13   :  { %2883 = vmatprep.mubr.msk.f32.mxu0 %vm132_vm0, %v68_v10  ;;  %v78_v20 = vld [vmem:[%s4870_s0 + $0x80] sm:$0xff]  ;;  %v79_v21 = vld [vmem:[%s4870_s0 + $0x88] sm:$0xff]  ;;  %v80_v22 = vld [vmem:[%s4870_s0 + $0x90] sm:$0xff] }
  0x14   :  { %v81_v23 = vld [vmem:[%s4870_s0 + $0x98] sm:$0xff]  ;;  %v82_v24 = vld [vmem:[%s4870_s0 + $0xa0] sm:$0xff]  ;;  %v83_v25 = vld [vmem:[%s4870_s0 + $0xa8] sm:$0xff] }
  0x15   :  { %v84_v26 = vld [vmem:[%s4870_s0 + $0xb0] sm:$0xff]  ;;  %v85_v27 = vld [vmem:[%s4870_s0 + $0xb8] sm:$0xff]  ;;  %v86_v28 = vld [vmem:[%s4870_s0 + $0xc0] sm:$0xff] }
  0x16   :  { %2884 = vmatmul.mubr.msk.f32.gmra.mrb[6].mxu0 %vm132_vm0, %v69_v11  ;;  %v87_v29 = vld [vmem:[%s4870_s0 + $0xc8] sm:$0xff]  ;;  %v88_v30 = vld [vmem:[%s4870_s0 + $0xd0] sm:$0xff]  ;;  %v89_v31 = vld [vmem:[%s4870_s0 + $0xd8] sm:$0xff] }
  0x17   :  { %2886 = vmatprep.mubr.msk.f32.mxu0 %vm132_vm0, %v70_v12  ;;  %v90_v32 = vld [vmem:[%s4870_s0 + $0xe0] sm:$0xff]  ;;  %v91_v33 = vld [vmem:[%s4870_s0 + $0xe8] sm:$0xff]  ;;  %v92_v34 = vld [vmem:[%s4870_s0 + $0xf0] sm:$0xff] }
  0x18   :  { %v93_v35 = vld [vmem:[%s4870_s0 + $0xf8] sm:$0xff]  ;;  %v53_v36 = vld [vmem:[%s4877_s7] sm:$0xf]  ;;  %v95_v38 = vld [vmem:[%s4871_s1 + $0x8] sm:$0xff] }
  0x19   :  { %2922 = vmatprep.subr.msk.mxu1 %vm1172_vm1, %v53_v36  ;;  %v94_v37 = vld [vmem:[%s4871_s1] sm:$0xff]  ;;  %v96_v39 = vld [vmem:[%s4871_s1 + $0x10] sm:$0xff]  ;;  %v50_v41 = vld [vmem:[%s4876_s6 + $0x8] sm:$0xff] }
  0x1a   :  { %2887 = vmatmul.mubr.msk.f32.gmra.mrb[8].mxu0 %vm132_vm0, %v71_v13  ;;  %2923 = vmatpush3.msk.msra.mxu1 %vm1172_vm1, %v53_v36  ;;  %v49_v40 = vld [vmem:[%s4876_s6] sm:$0xff]  ;;  %v97_v43 = vld [vmem:[%s4871_s1 + $0x18] sm:$0xff]  ;;  %v99_v45 = vld [vmem:[%s4871_s1 + $0x28] sm:$0xff] }
  0x1b   :  { %2889 = vmatprep.mubr.msk.f32.mxu0 %vm132_vm0, %v72_v14  ;;  %2924 = vmatprep.mubr.msk.f32.mxu1 %vm1075_vm2, %v94_v37  ;;  %v3032_v42 = vpack.c.bf16 %v50_v41, %v49_v40  ;;  %v98_v44 = vld [vmem:[%s4871_s1 + $0x20] sm:$0xff]  ;;  %v100_v47 = vld [vmem:[%s4871_s1 + $0x30] sm:$0xff]  ;;  %v101_v48 = vld [vmem:[%s4871_s1 + $0x38] sm:$0xff] }
  0x1c   :  { %2925 = vmatmul.mubr.msk.f32.vlgmr.msra.gmra.mrb[0].mxu1 %vm1075_vm2, %v95_v38  ;;  %v3522_v46 = vld [vmem:[%s4873_s3] ss:$0 sm:$0xff]  ;;  %v103_v54 = vld [vmem:[%s4871_s1 + $0x48] sm:$0xff]  ;;  %v104_v55 = vld [vmem:[%s4871_s1 + $0x50] sm:$0xff] }
  0x1d   :  { %2927 = vmatprep.mubr.msk.f32.mxu1 %vm1075_vm2, %v96_v39  ;;  %3033 = vmatprep.subr.bf16.mxu1 %v3032_v42  ;;  %v102_v53 = vld [vmem:[%s4871_s1 + $0x40] sm:$0xff]  ;;  %v105_v62 = vld [vmem:[%s4871_s1 + $0x58] sm:$0xff]  ;;  %v107_v7 = vld [vmem:[%s4871_s1 + $0x68] sm:$0xff] }
  0x1e   :  { %2890 = vmatmul.mubr.msk.f32.gmra.mrb[10].mxu0 %vm132_vm0, %v73_v15  ;;  %3035 = vmatpush3.bf16.msra.mxu1 %v3032_v42  ;;  %v106_v0 = vld [vmem:[%s4871_s1 + $0x60] sm:$0xff]  ;;  %v108_v8 = vld [vmem:[%s4871_s1 + $0x70] sm:$0xff]  ;;  %v109_v15 = vld [vmem:[%s4871_s1 + $0x78] sm:$0xff] }
  0x1f   :  { %2892 = vmatprep.mubr.msk.f32.mxu0 %vm132_vm0, %v74_v16  ;;  %v114_v38 = vld [vmem:[%s4871_s1 + $0xa0] sm:$0xff]  ;;  %v115_v41 = vld [vmem:[%s4871_s1 + $0xa8] sm:$0xff]  ;;  %vm4671_vm5 = vmpackc.low %vm1760_vm4, %vm1760_vm4 }
  0x20   :  { %2928 = vmatmul.mubr.msk.f32.gmra.mrb[2].mxu1 %vm1075_vm2, %v97_v43 }
  0x21   :  { %2930 = vmatprep.mubr.msk.f32.mxu1 %vm1075_vm2, %v98_v44 }
  0x22   :  { %2893 = vmatmul.mubr.msk.f32.gmra.mrb[12].mxu0 %vm132_vm0, %v75_v17 }
  0x23   :  { %2895 = vmatprep.mubr.msk.f32.mxu0 %vm132_vm0, %v76_v18 }
  0x24   :  { %2931 = vmatmul.mubr.msk.f32.gmra.mrb[4].mxu1 %vm1075_vm2, %v99_v45 }
  0x25   :  { %2933 = vmatprep.mubr.msk.f32.mxu1 %vm1075_vm2, %v100_v47 }
  0x26   :  { %2896 = vmatmul.mubr.msk.f32.gmra.mrb[14].mxu0 %vm132_vm0, %v77_v19 }
  0x27   :  { %2898 = vmatprep.mubr.msk.f32.mxu0 %vm132_vm0, %v78_v20 }
  0x28   :  { %2934 = vmatmul.mubr.msk.f32.gmra.mrb[6].mxu1 %vm1075_vm2, %v101_v48  ;;  %v116_v48 = vld [vmem:[%s4871_s1 + $0xb0] sm:$0xff] }
  0x29   :  { %2936 = vmatprep.mubr.msk.f32.mxu1 %vm1075_vm2, %v102_v53 }
  0x2a   :  { %2899 = vmatmul.mubr.msk.f32.gmra.mrb[16].mxu0 %vm132_vm0, %v79_v21 }
  0x2b   :  { %2901 = vmatprep.mubr.msk.f32.mxu0 %vm132_vm0, %v80_v22  ;;  %v110_v22 = vld [vmem:[%s4871_s1 + $0x80] sm:$0xff] }
  0x2c   :  { %2937 = vmatmul.mubr.msk.f32.gmra.mrb[8].mxu1 %vm1075_vm2, %v103_v54 }
  0x2d   :  { %2939 = vmatprep.mubr.msk.f32.mxu1 %vm1075_vm2, %v104_v55 }
  0x2e   :  { %2902 = vmatmul.mubr.msk.f32.gmra.mrb[18].mxu0 %vm132_vm0, %v81_v23 }
  0x2f   :  { %2904 = vmatprep.mubr.msk.f32.mxu0 %vm132_vm0, %v82_v24  ;;  %v111_v24 = vld [vmem:[%s4871_s1 + $0x88] sm:$0xff] }
  0x30   :  { %2940 = vmatmul.mubr.msk.f32.gmra.mrb[10].mxu1 %vm1075_vm2, %v105_v62  ;;  %v119_v62 = vld [vmem:[%s4871_s1 + $0xc8] sm:$0xff] }
  0x31   :  { %2942 = vmatprep.mubr.msk.f32.mxu1 %vm1075_vm2, %v106_v0 }
  0x32   :  { %2905 = vmatmul.mubr.msk.f32.gmra.mrb[20].mxu0 %vm132_vm0, %v83_v25 }
  0x33   :  { %2907 = vmatprep.mubr.msk.f32.mxu0 %vm132_vm0, %v84_v26 }
  0x34   :  { %2943 = vmatmul.mubr.msk.f32.gmra.mrb[12].mxu1 %vm1075_vm2, %v107_v7 }
  0x35   :  { %2945 = vmatprep.mubr.msk.f32.mxu1 %vm1075_vm2, %v108_v8  ;;  %v120_v8 = vld [vmem:[%s4871_s1 + $0xd0] sm:$0xff] }
  0x36   :  { %2908 = vmatmul.mubr.msk.f32.gmra.mrb[22].mxu0 %vm132_vm0, %v85_v27 }
  0x37   :  { %2910 = vmatprep.mubr.msk.f32.mxu0 %vm132_vm0, %v86_v28 }
  0x38   :  { %2946 = vmatmul.mubr.msk.f32.gmra.mrb[14].mxu1 %vm1075_vm2, %v109_v15 }
  0x39   :  { %2948 = vmatprep.mubr.msk.f32.mxu1 %vm1075_vm2, %v110_v22 }
  0x3a   :  { %2911 = vmatmul.mubr.msk.f32.gmra.mrb[24].mxu0 %vm132_vm0, %v87_v29 }
  0x3b   :  { %2913 = vmatprep.mubr.msk.f32.mxu0 %vm132_vm0, %v88_v30  ;;  %v112_v30 = vld [vmem:[%s4871_s1 + $0x90] sm:$0xff] }
  0x3c   :  { %2949 = vmatmul.mubr.msk.f32.gmra.mrb[16].mxu1 %vm1075_vm2, %v111_v24 }
  0x3d   :  { %2951 = vmatprep.mubr.msk.f32.mxu1 %vm1075_vm2, %v112_v30 }
  0x3e   :  { %2914 = vmatmul.mubr.msk.f32.gmra.mrb[26].mxu0 %vm132_vm0, %v89_v31 }
  0x3f   :  { %2916 = vmatprep.mubr.msk.f32.mxu0 %vm132_vm0, %v90_v32  ;;  %v113_v32 = vld [vmem:[%s4871_s1 + $0x98] sm:$0xff] }
  0x40   :  { %2952 = vmatmul.mubr.msk.f32.gmra.mrb[18].mxu1 %vm1075_vm2, %v113_v32 }
  0x41   :  { %2954 = vmatprep.mubr.msk.f32.mxu1 %vm1075_vm2, %v114_v38  ;;  %v125_v38 = vld [vmem:[%s4871_s1 + $0xf8] sm:$0xff] }
  0x42   :  { %2917 = vmatmul.mubr.msk.f32.gmra.mrb[28].mxu0 %vm132_vm0, %v91_v33 }
  0x43   :  { %2919 = vmatprep.mubr.msk.f32.mxu0 %vm132_vm0, %v92_v34 }
  0x44   :  { %2955 = vmatmul.mubr.msk.f32.gmra.mrb[20].mxu1 %vm1075_vm2, %v115_v41 }
  0x45   :  { %2957 = vmatprep.mubr.msk.f32.mxu1 %vm1075_vm2, %v116_v48 }
  0x46   :  { %2920 = vmatmul.mubr.msk.f32.gmra.mrb[30].mxu0 %vm132_vm0, %v93_v35 }
  0xdd   :  { %v2876_v49 = vpop.f32.mrb[0].mxu0 }
  0xde   :  { %v3533_v50 = vadd.f32 %v2876_v49, %v3522_v46  ;;  %v295_v51 = vpop.f32.mrb[1].mxu0 }
  0xdf   :  { %v3536_v52 = vadd.f32 %v3522_v46, %v295_v51  ;;  %v117_v51 = vld [vmem:[%s4871_s1 + $0xb8] sm:$0xff] }
  0xe0   :  { %v458_v56 = vsel %vm454_vm3, %v3533_v50, 0.0  ;;  %v552_v57 = vmul.f32 %v3533_v50, %v3533_v50  ;;  %2958 = vmatmul.mubr.msk.f32.gmra.mrb[22].mxu1 %vm1075_vm2, %v117_v51 }
  0xe1   :  { %459 = vadd.xlane.f32.xlu0 %v458_v56  ;;  %v2879_v58 = vpop.f32.mrb[2].mxu0  ;;  %v551_v61 = vmul.f32 %v3536_v52, %v3536_v52  ;;  %v455_v1 = vsel %vm454_vm3, %v3536_v52, 0.0 }
  0xe2   :  { %v586_v59 = vsel %vm454_vm3, %v552_v57, 0.0  ;;  %v305_v60 = vpop.f32.mrb[3].mxu0  ;;  %v3570_v3 = vadd.f32 %v2879_v58, %v3522_v46 }
  0xe3   :  { %587 = vadd.xlane.f32.xlu1 %v586_v59  ;;  %v3561_v63 = vadd.f32 %v3522_v46, %v305_v60  ;;  %v583_v4 = vsel %vm454_vm3, %v551_v61, 0.0  ;;  %v118_v60 = vld [vmem:[%s4871_s1 + $0xc0] sm:$0xff] }
  0xe4   :  { %v464_v11 = vsel %vm454_vm3, %v3570_v3, 0.0  ;;  %v554_v13 = vmul.f32 %v3570_v3, %v3570_v3  ;;  %2960 = vmatprep.mubr.msk.f32.mxu1 %vm1075_vm2, %v118_v60 }
  0xe5   :  { %456 = vadd.xlane.f32.xlu0 %v455_v1  ;;  %v2882_v2 = vpop.f32.mrb[4].mxu0  ;;  %v461_v5 = vsel %vm454_vm3, %v3561_v63, 0.0  ;;  %v553_v9 = vmul.f32 %v3561_v63, %v3561_v63  ;;  %2961 = vmatmul.mubr.msk.f32.gmra.mrb[24].mxu1 %vm1075_vm2, %v119_v62 }
  0xe6   :  { %v315_v6 = vpop.f32.mrb[5].mxu0  ;;  %v3599_v18 = vadd.f32 %v2882_v2, %v3522_v46  ;;  %v592_v19 = vsel %vm454_vm3, %v554_v13, 0.0  ;;  %2963 = vmatprep.mubr.msk.f32.mxu1 %vm1075_vm2, %v120_v8 }
  0xe7   :  { %584 = vadd.xlane.f32.xlu1 %v583_v4  ;;  %v3588_v12 = vadd.f32 %v3522_v46, %v315_v6  ;;  %v589_v16 = vsel %vm454_vm3, %v553_v9, 0.0 }
  0xe8   :  { %v470_v26 = vsel %vm454_vm3, %v3599_v18, 0.0  ;;  %v556_v28 = vmul.f32 %v3599_v18, %v3599_v18 }
  0xe9   :  { %462 = vadd.xlane.f32.xlu0 %v461_v5  ;;  %v2885_v10 = vpop.f32.mrb[6].mxu0  ;;  %v467_v20 = vsel %vm454_vm3, %v3588_v12, 0.0  ;;  %v555_v23 = vmul.f32 %v3588_v12, %v3588_v12 }
  0xea   :  { %v325_v14 = vpop.f32.mrb[7].mxu0  ;;  %v3635_v34 = vadd.f32 %v2885_v10, %v3522_v46  ;;  %v598_v35 = vsel %vm454_vm3, %v556_v28, 0.0  ;;  %v121_v10 = vld [vmem:[%s4871_s1 + $0xd8] sm:$0xff] }
  0xeb   :  { %465 = vadd.xlane.f32.xlu1 %v464_v11  ;;  %v3619_v27 = vadd.f32 %v3522_v46, %v325_v14  ;;  %v595_v31 = vsel %vm454_vm3, %v555_v23, 0.0  ;;  %2964 = vmatmul.mubr.msk.f32.gmra.mrb[26].mxu1 %vm1075_vm2, %v121_v10  ;;  %v122_v23 = vld [vmem:[%s4871_s1 + $0xe0] sm:$0xff] }
  0xec   :  { %v476_v42 = vsel %vm454_vm3, %v3635_v34, 0.0  ;;  %v558_v44 = vmul.f32 %v3635_v34, %v3635_v34  ;;  %2966 = vmatprep.mubr.msk.f32.mxu1 %vm1075_vm2, %v122_v23 }
  0xed   :  { %590 = vadd.xlane.f32.xlu0 %v589_v16  ;;  %v2888_v17 = vpop.f32.mrb[8].mxu0  ;;  %v473_v36 = vsel %vm454_vm3, %v3619_v27, 0.0  ;;  %v557_v39 = vmul.f32 %v3619_v27, %v3619_v27 }
  0xee   :  { %v335_v21 = vpop.f32.mrb[9].mxu0  ;;  %v3672_v53 = vadd.f32 %v2888_v17, %v3522_v46  ;;  %v604_v54 = vsel %vm454_vm3, %v558_v44, 0.0  ;;  %v51_v17 = vld [vmem:[%s4876_s6 + $0x10] sm:$0xff] }
  0xef   :  { %593 = vadd.xlane.f32.xlu1 %v592_v19  ;;  %v3656_v43 = vadd.f32 %v3522_v46, %v335_v21  ;;  %v601_v47 = vsel %vm454_vm3, %v557_v39, 0.0  ;;  %v52_v19 = vld [vmem:[%s4876_s6 + $0x18] sm:$0xff] }
  0xf0   :  { %v482_v0 = vsel %vm454_vm3, %v3672_v53, 0.0  ;;  %v560_v2 = vmul.f32 %v3672_v53, %v3672_v53  ;;  %v3036_v21 = vpack.c.bf16 %v52_v19, %v51_v17 }
  0xf1   :  { %468 = vadd.xlane.f32.xlu0 %v467_v20  ;;  %v3613_v25 = vpop.f32.mrb[10].mxu0  ;;  %v479_v55 = vsel %vm454_vm3, %v3656_v43, 0.0  ;;  %v559_v59 = vmul.f32 %v3656_v43, %v3656_v43 }
  0xf2   :  { %v345_v29 = vpop.f32.mrb[11].mxu0  ;;  %v3717_v11 = vadd.f32 %v3613_v25, %v3522_v46  ;;  %v610_v13 = vsel %vm454_vm3, %v560_v2, 0.0  ;;  %3037 = vmatprep.subr.bf16.mxu1 %v3036_v21  ;;  %v123_v25 = vld [vmem:[%s4871_s1 + $0xe8] sm:$0xff] }
  0xf3   :  { %471 = vadd.xlane.f32.xlu1 %v470_v26  ;;  %v3696_v1 = vadd.f32 %v3522_v46, %v345_v29  ;;  %v607_v7 = vsel %vm454_vm3, %v559_v59, 0.0  ;;  %3039 = vmatpush3.bf16.msra.mxu1 %v3036_v21 }
  0xf4   :  { %v488_v26 = vsel %vm454_vm3, %v3717_v11, 0.0  ;;  %v562_v29 = vmul.f32 %v3717_v11, %v3717_v11  ;;  %2967 = vmatmul.mubr.msk.f32.gmra.mrb[28].mxu1 %vm1075_vm2, %v123_v25 }
  0xf5   :  { %596 = vadd.xlane.f32.xlu0 %v595_v31  ;;  %v3631_v33 = vpop.f32.mrb[12].mxu0  ;;  %v485_v14 = vsel %vm454_vm3, %v3696_v1, 0.0  ;;  %v561_v22 = vmul.f32 %v3696_v1, %v3696_v1 }
  0xf6   :  { %v3640_v37 = vpop.f32.mrb[13].mxu0  ;;  %v3769_v39 = vadd.f32 %v3631_v33, %v3522_v46  ;;  %v616_v41 = vsel %vm454_vm3, %v562_v29, 0.0 }
  0xf7   :  { %599 = vadd.xlane.f32.xlu1 %v598_v35  ;;  %v3747_v28 = vadd.f32 %v3522_v46, %v3640_v37  ;;  %v613_v35 = vsel %vm454_vm3, %v561_v22, 0.0 }
  0xf8   :  { %v494_v51 = vsel %vm454_vm3, %v3769_v39, 0.0 }
  0xf9   :  { %474 = vadd.xlane.f32.xlu0 %v473_v36  ;;  %v3648_v40 = vpop.f32.mrb[14].mxu0  ;;  %v124_v36 = vld [vmem:[%s4871_s1 + $0xf0] sm:$0xff] }
  0xfa   :  { %v3660_v45 = vpop.f32.mrb[15].mxu0  ;;  %2969 = vmatprep.mubr.msk.f32.mxu1 %vm1075_vm2, %v124_v36 }
  0xfb   :  { %477 = vadd.xlane.f32.xlu1 %v476_v42  ;;  %v491_v42 = vsel %vm454_vm3, %v3747_v28, 0.0  ;;  %2970 = vmatmul.mubr.msk.f32.gmra.mrb[30].mxu1 %vm1075_vm2, %v125_v38 }
  0xfd   :  { %602 = vadd.xlane.f32.xlu0 %v601_v47  ;;  %v2900_v49 = vpop.f32.mrb[16].mxu0 }
  0xfe   :  { %v3678_v56 = vadd.f32 %v2900_v49, %v3522_v46  ;;  %v375_v57 = vpop.f32.mrb[17].mxu0  ;;  %v563_v49 = vmul.f32 %v3747_v28, %v3747_v28 }
  0xff   :  { %605 = vadd.xlane.f32.xlu1 %v604_v54  ;;  %v3682_v58 = vadd.f32 %v3522_v46, %v375_v57  ;;  %v3787_v54 = vadd.f32 %v3522_v46, %v3660_v45 }
 0x101   :  { %480 = vadd.xlane.f32.xlu0 %v479_v55  ;;  %v2903_v61 = vpop.f32.mrb[18].mxu0  ;;  %v564_v55 = vmul.f32 %v3769_v39, %v3769_v39  ;;  %v497_v2 = vsel %vm454_vm3, %v3787_v54, 0.0  ;;  %v503_v22 = vsel %vm454_vm3, %v3682_v58, 0.0  ;;  %v567_v23 = vmul.f32 %v3682_v58, %v3682_v58 }
 0x102   :  { %v3701_v4 = vadd.f32 %v2903_v61, %v3522_v46  ;;  %v385_v5 = vpop.f32.mrb[19].mxu0  ;;  %v619_v61 = vsel %vm454_vm3, %v563_v49, 0.0 }
 0x103   :  { %483 = vadd.xlane.f32.xlu1 %v482_v0  ;;  %v3705_v6 = vadd.f32 %v3522_v46, %v385_v5  ;;  %v3800_v0 = vadd.f32 %v3648_v40, %v3522_v46  ;;  %v622_v45 = vsel %vm454_vm3, %v564_v55, 0.0  ;;  %v631_v25 = vsel %vm454_vm3, %v567_v23, 0.0 }
 0x104   :  { %v570_v36 = vmul.f32 %v3701_v4, %v3701_v4 }
 0x105   :  { %608 = vadd.xlane.f32.xlu0 %v607_v7  ;;  %v2906_v9 = vpop.f32.mrb[20].mxu0  ;;  %v500_v40 = vsel %vm454_vm3, %v3800_v0, 0.0  ;;  %v509_v29 = vsel %vm454_vm3, %v3705_v6, 0.0 }
 0x106   :  { %v3723_v15 = vadd.f32 %v2906_v9, %v3522_v46  ;;  %v395_v16 = vpop.f32.mrb[21].mxu0  ;;  %v565_v9 = vmul.f32 %v3787_v54, %v3787_v54  ;;  %v640_v38 = vsel %vm454_vm3, %v570_v36, 0.0 }
 0x107   :  { %611 = vadd.xlane.f32.xlu1 %v610_v13  ;;  %v3733_v20 = vadd.f32 %v3522_v46, %v395_v16  ;;  %v566_v13 = vmul.f32 %v3800_v0, %v3800_v0 }
 0x108   :  { %v625_v19 = vsel %vm454_vm3, %v565_v9, 0.0  ;;  %v572_v49 = vmul.f32 %v3723_v15, %v3723_v15 }
 0x109   :  { %486 = vadd.xlane.f32.xlu0 %v485_v14  ;;  %v2909_v24 = vpop.f32.mrb[22].mxu0  ;;  %v628_v21 = vsel %vm454_vm3, %v566_v13, 0.0 }
 0x10a   :  { %v3752_v30 = vadd.f32 %v2909_v24, %v3522_v46  ;;  %v405_v31 = vpop.f32.mrb[23].mxu0  ;;  %v506_v24 = vsel %vm454_vm3, %v3678_v56, 0.0 }
 0x10b   :  { %489 = vadd.xlane.f32.xlu1 %v488_v26  ;;  %v3756_v32 = vadd.f32 %v3522_v46, %v405_v31  ;;  %v569_v31 = vmul.f32 %v3705_v6, %v3705_v6 }
 0x10d   :  { %614 = vadd.xlane.f32.xlu0 %v613_v35  ;;  %v2912_v37 = vpop.f32.mrb[24].mxu0  ;;  %v512_v35 = vsel %vm454_vm3, %v3701_v4, 0.0  ;;  %v521_v55 = vsel %vm454_vm3, %v3756_v32, 0.0 }
 0x10e   :  { %v3775_v44 = vadd.f32 %v2912_v37, %v3522_v46  ;;  %v415_v47 = vpop.f32.mrb[25].mxu0  ;;  %v637_v37 = vsel %vm454_vm3, %v569_v31, 0.0 }
 0x10f   :  { %617 = vadd.xlane.f32.xlu1 %v616_v41  ;;  %v3778_v48 = vadd.f32 %v3522_v46, %v415_v47  ;;  %v515_v41 = vsel %vm454_vm3, %v3733_v20, 0.0  ;;  %v518_v47 = vsel %vm454_vm3, %v3723_v15, 0.0 }
 0x111   :  { %492 = vadd.xlane.f32.xlu0 %v491_v42  ;;  %v2915_v33 = vpop.f32.mrb[26].mxu0  ;;  %v571_v42 = vmul.f32 %v3733_v20, %v3733_v20  ;;  %v575_v9 = vmul.f32 %v3778_v48, %v3778_v48 }
 0x112   :  { %v3792_v57 = vadd.f32 %v2915_v33, %v3522_v46  ;;  %v425_v59 = vpop.f32.mrb[27].mxu0 }
 0x113   :  { %495 = vadd.xlane.f32.xlu1 %v494_v51  ;;  %v3795_v60 = vadd.f32 %v3522_v46, %v425_v59  ;;  %v643_v33 = vsel %vm454_vm3, %v571_v42, 0.0  ;;  %v646_v51 = vsel %vm454_vm3, %v572_v49, 0.0  ;;  %v573_v59 = vmul.f32 %v3756_v32, %v3756_v32 }
 0x114   :  { %v655_v13 = vsel %vm454_vm3, %v575_v9, 0.0  ;;  %v578_v23 = vmul.f32 %v3792_v57, %v3792_v57 }
 0x115   :  { %620 = vadd.xlane.f32.xlu0 %v619_v61  ;;  %v2918_v62 = vpop.f32.mrb[28].mxu0  ;;  %v524_v61 = vsel %vm454_vm3, %v3752_v30, 0.0 }
 0x116   :  { %v3806_v5 = vadd.f32 %v2918_v62, %v3522_v46  ;;  %v435_v7 = vpop.f32.mrb[29].mxu0  ;;  %v574_v62 = vmul.f32 %v3752_v30, %v3752_v30 }
 0x117   :  { %623 = vadd.xlane.f32.xlu1 %v622_v45  ;;  %v3809_v8 = vadd.f32 %v3522_v46, %v435_v7  ;;  %v649_v45 = vsel %vm454_vm3, %v573_v59, 0.0  ;;  %v527_v7 = vsel %vm454_vm3, %v3778_v48, 0.0 }
 0x118   :  { %v580_v31 = vmul.f32 %v3806_v5, %v3806_v5 }
 0x119   :  { %498 = vadd.xlane.f32.xlu0 %v497_v2  ;;  %v2921_v10 = vpop.f32.mrb[30].mxu0  ;;  %v652_v2 = vsel %vm454_vm3, %v574_v62, 0.0 }
 0x11a   :  { %v3818_v14 = vadd.f32 %v2921_v10, %v3522_v46  ;;  %v445_v16 = vpop.f32.mrb[31].mxu0  ;;  %v530_v10 = vsel %vm454_vm3, %v3775_v44, 0.0  ;;  %v670_v36 = vsel %vm454_vm3, %v580_v31, 0.0 }
 0x11b   :  { %501 = vadd.xlane.f32.xlu1 %v500_v40  ;;  %v3821_v17 = vadd.f32 %v3522_v46, %v445_v16  ;;  %v568_v46 = vmul.f32 %v3678_v56, %v3678_v56  ;;  %v576_v40 = vmul.f32 %v3775_v44, %v3775_v44 }
 0x11c   :  { %v582_v42 = vmul.f32 %v3818_v14, %v3818_v14 }
 0x11d   :  { %626 = vadd.xlane.f32.xlu0 %v625_v19  ;;  %v634_v26 = vsel %vm454_vm3, %v568_v46, 0.0  ;;  %v658_v16 = vsel %vm454_vm3, %v576_v40, 0.0  ;;  %v533_v19 = vsel %vm454_vm3, %v3795_v60, 0.0  ;;  %v664_v46 = vsel %vm454_vm3, %v578_v23, 0.0 }
 0x11e   :  { %v676_v49 = vsel %vm454_vm3, %v582_v42, 0.0 }
 0x11f   :  { %629 = vadd.xlane.f32.xlu1 %v628_v21  ;;  %v577_v21 = vmul.f32 %v3795_v60, %v3795_v60 }
 0x121   :  { %504 = vadd.xlane.f32.xlu0 %v503_v22  ;;  %v536_v22 = vsel %vm454_vm3, %v3792_v57, 0.0 }
 0x123   :  { %507 = vadd.xlane.f32.xlu1 %v506_v24  ;;  %v661_v24 = vsel %vm454_vm3, %v577_v21, 0.0 }
 0x125   :  { %632 = vadd.xlane.f32.xlu0 %v631_v25  ;;  %v539_v25 = vsel %vm454_vm3, %v3809_v8, 0.0 }
 0x127   :  { %635 = vadd.xlane.f32.xlu1 %v634_v26  ;;  %v579_v26 = vmul.f32 %v3809_v8, %v3809_v8 }
 0x129   :  { %510 = vadd.xlane.f32.xlu0 %v509_v29  ;;  %v542_v29 = vsel %vm454_vm3, %v3806_v5, 0.0 }
 0x12b   :  { %513 = vadd.xlane.f32.xlu1 %v512_v35  ;;  %v667_v35 = vsel %vm454_vm3, %v579_v26, 0.0 }
 0x12d   :  { %638 = vadd.xlane.f32.xlu0 %v637_v37  ;;  %v545_v37 = vsel %vm454_vm3, %v3821_v17, 0.0 }
 0x12f   :  { %641 = vadd.xlane.f32.xlu1 %v640_v38  ;;  %v581_v38 = vmul.f32 %v3821_v17, %v3821_v17 }
 0x131   :  { %516 = vadd.xlane.f32.xlu0 %v515_v41  ;;  %v548_v41 = vsel %vm454_vm3, %v3818_v14, 0.0 }
 0x133   :  { %519 = vadd.xlane.f32.xlu1 %v518_v47  ;;  %v673_v47 = vsel %vm454_vm3, %v581_v38, 0.0 }
 0x135   :  { %644 = vadd.xlane.f32.xlu0 %v643_v33 }
 0x137   :  { %647 = vadd.xlane.f32.xlu1 %v646_v51 }
 0x139   :  { %522 = vadd.xlane.f32.xlu0 %v521_v55 }
 0x13b   :  { %525 = vadd.xlane.f32.xlu1 %v524_v61 }
 0x13d   :  { %650 = vadd.xlane.f32.xlu0 %v649_v45 }
 0x13f   :  { %653 = vadd.xlane.f32.xlu1 %v652_v2 }
 0x141   :  { %528 = vadd.xlane.f32.xlu0 %v527_v7 }
 0x143   :  { %531 = vadd.xlane.f32.xlu1 %v530_v10 }
 0x145   :  { %656 = vadd.xlane.f32.xlu0 %v655_v13 }
 0x147   :  { %659 = vadd.xlane.f32.xlu1 %v658_v16 }
 0x149   :  { %534 = vadd.xlane.f32.xlu0 %v533_v19 }
 0x14b   :  { %537 = vadd.xlane.f32.xlu1 %v536_v22 }
 0x14d   :  { %662 = vadd.xlane.f32.xlu0 %v661_v24 }
 0x14f   :  { %665 = vadd.xlane.f32.xlu1 %v664_v46 }
 0x151   :  { %540 = vadd.xlane.f32.xlu0 %v539_v25 }
 0x153   :  { %543 = vadd.xlane.f32.xlu1 %v542_v29 }
 0x155   :  { %668 = vadd.xlane.f32.xlu0 %v667_v35 }
 0x157   :  { %671 = vadd.xlane.f32.xlu1 %v670_v36 }
 0x159   :  { %546 = vadd.xlane.f32.xlu0 %v545_v37 }
 0x15b   :  { %549 = vadd.xlane.f32.xlu1 %v548_v41 }
 0x15d   :  { %674 = vadd.xlane.f32.xlu0 %v673_v47 }
 0x15f   :  { %677 = vadd.xlane.f32.xlu1 %v676_v49 }
 0x16e   :  { %v460_v33 = vpop.xlane.xlu0 %459 }
 0x16f   :  { %v680_v51 = vmul.f32 0.03125, %v460_v33 }
 0x170   :  { %v588_v55 = vpop.xlane.xlu1 %587 }
 0x171   :  { %v744_v59 = vmul.f32 %v680_v51, %v680_v51  ;;  %v712_v61 = vmul.f32 0.03125, %v588_v55 }
 0x172   :  { %v457_v62 = vpop.xlane.xlu0 %456 }
 0x173   :  { %v776_v45 = vsub.f32 %v712_v61, %v744_v59  ;;  %v679_v2 = vmul.f32 0.03125, %v457_v62  ;;  %v840_v59 = vsub.f32 %v3533_v50, %v680_v51 }
 0x174   :  { %v585_v7 = vpop.xlane.xlu1 %584 }
 0x175   :  { %v808_v9 = vmax.f32 %v776_v45, 0.0  ;;  %v743_v10 = vmul.f32 %v679_v2, %v679_v2  ;;  %v711_v40 = vmul.f32 0.03125, %v585_v7  ;;  %v3921_v7 = vld [vmem:[%s4874_s4] ss:$0 sm:$0xff] }
 0x176   :  { %v463_v13 = vpop.xlane.xlu0 %462 }
 0x177   :  { %v872_v16 = vadd.f32 1e-05, %v808_v9  ;;  %v775_v19 = vsub.f32 %v711_v40, %v743_v10  ;;  %v3905_v21 = vmul.f32 0.03125, %v463_v13 }
 0x178   :  { %v466_v22 = vpop.xlane.xlu1 %465 }
 0x179   :  { %3124 = vrsqrt.f32 %v872_v16  ;;  %v807_v23 = vmax.f32 %v775_v19, 0.0  ;;  %v3907_v24 = vmul.f32 0.03125, %v466_v22  ;;  %v745_v26 = vmul.f32 %v3905_v21, %v3905_v21 }
 0x17a   :  { %v591_v46 = vpop.xlane.xlu0 %590 }
 0x17b   :  { %v871_v25 = vadd.f32 1e-05, %v807_v23  ;;  %v713_v29 = vmul.f32 0.03125, %v591_v46  ;;  %v746_v35 = vmul.f32 %v3907_v24, %v3907_v24  ;;  %v839_v23 = vsub.f32 %v3536_v52, %v679_v2 }
 0x17c   :  { %v594_v31 = vpop.xlane.xlu1 %593 }
 0x17d   :  { %3126 = vrsqrt.f32 %v871_v25  ;;  %v777_v36 = vsub.f32 %v713_v29, %v745_v26  ;;  %v714_v37 = vmul.f32 0.03125, %v594_v31 }
 0x17e   :  { %v469_v38 = vpop.xlane.xlu0 %468 }
 0x17f   :  { %v809_v41 = vmax.f32 %v777_v36, 0.0  ;;  %v778_v42 = vsub.f32 %v714_v37, %v746_v35  ;;  %v3913_v47 = vmul.f32 0.03125, %v469_v38  ;;  %v3934_v35 = vld [vmem:[%s4875_s5] ss:$0 sm:$0xff] }
 0x180   :  { %v472_v49 = vpop.xlane.xlu1 %471 }
 0x181   :  { %v873_v33 = vadd.f32 1e-05, %v809_v41  ;;  %v810_v55 = vmax.f32 %v778_v42, 0.0  ;;  %v3916_v61 = vmul.f32 0.03125, %v472_v49  ;;  %v747_v10 = vmul.f32 %v3913_v47, %v3913_v47 }
 0x182   :  { %v597_v62 = vpop.xlane.xlu0 %596 }
 0x183   :  { %v3125_v45 = vpop.eup %3124  ;;  %3128 = vrsqrt.f32 %v873_v33  ;;  %v874_v9 = vadd.f32 1e-05, %v810_v55  ;;  %v715_v40 = vmul.f32 0.03125, %v597_v62  ;;  %v748_v50 = vmul.f32 %v3916_v61, %v3916_v61 }
 0x184   :  { %v936_v13 = vmul.f32 %v3125_v45, %v840_v59  ;;  %v600_v16 = vpop.xlane.xlu1 %599  ;;  %v841_v62 = vsub.f32 %v3561_v63, %v3905_v21 }
 0x185   :  { %3130 = vrsqrt.f32 %v874_v9  ;;  %v779_v51 = vsub.f32 %v715_v40, %v747_v10  ;;  %v716_v19 = vmul.f32 0.03125, %v600_v16 }
 0x186   :  { %v974_v22 = vmul.f32 %v3921_v7, %v936_v13  ;;  %v475_v46 = vpop.xlane.xlu0 %474 }
 0x187   :  { %v3127_v25 = vpop.eup %3126  ;;  %v811_v26 = vmax.f32 %v779_v51, 0.0  ;;  %v780_v29 = vsub.f32 %v716_v19, %v748_v50  ;;  %v3929_v31 = vmul.f32 0.03125, %v475_v46  ;;  %v842_v50 = vsub.f32 %v3570_v3, %v3907_v24 }
 0x188   :  { %v478_v36 = vpop.xlane.xlu1 %477  ;;  %v935_v37 = vmul.f32 %v3127_v25, %v839_v23  ;;  %v1012_v2 = vadd.f32 %v3934_v35, %v974_v22 }
 0x189   :  { %v875_v38 = vadd.f32 1e-05, %v811_v26  ;;  %v812_v41 = vmax.f32 %v780_v29, 0.0  ;;  %v3936_v42 = vmul.f32 0.03125, %v478_v36  ;;  %v749_v55 = vmul.f32 %v3929_v31, %v3929_v31 }
 0x18a   :  { %v603_v49 = vpop.xlane.xlu0 %602  ;;  %v973_v52 = vmul.f32 %v3921_v7, %v935_v37  ;;  %v1044_v21 = vmax.f32 %v1012_v2, 0.0 }
 0x18b   :  { %3132 = vrsqrt.f32 %v875_v38  ;;  %v876_v33 = vadd.f32 1e-05, %v812_v41  ;;  %v717_v59 = vmul.f32 0.03125, %v603_v49  ;;  %v750_v40 = vmul.f32 %v3936_v42, %v3936_v42 }
 0x18c   :  { %v606_v45 = vpop.xlane.xlu1 %605  ;;  %v1011_v9 = vadd.f32 %v3934_v35, %v973_v52 }
 0x18d   :  { %v3129_v10 = vpop.eup %3128  ;;  %3134 = vrsqrt.f32 %v876_v33  ;;  %v781_v13 = vsub.f32 %v717_v59, %v749_v55  ;;  %v718_v16 = vmul.f32 0.03125, %v606_v45  ;;  %v843_v55 = vsub.f32 %v3588_v12, %v3913_v47 }
 0x18e   :  { %v481_v51 = vpop.xlane.xlu0 %480  ;;  %v1043_v19 = vmax.f32 %v1011_v9, 0.0  ;;  %v937_v22 = vmul.f32 %v3129_v10, %v841_v62 }
 0x18f   :  { %v3131_v23 = vpop.eup %3130  ;;  %v813_v46 = vmax.f32 %v781_v13, 0.0  ;;  %v782_v25 = vsub.f32 %v718_v16, %v750_v40  ;;  %v3949_v63 = vmul.f32 0.03125, %v481_v51  ;;  %v844_v16 = vsub.f32 %v3599_v18, %v3916_v61 }
 0x190   :  { %v484_v26 = vpop.xlane.xlu1 %483  ;;  %2980 = vmatprep.mubr.msk.f32.mxu1 %vm454_vm3, %v1043_v19  ;;  %v975_v29 = vmul.f32 %v3921_v7, %v937_v22  ;;  %v938_v36 = vmul.f32 %v3131_v23, %v842_v50 }
 0x191   :  { %v877_v37 = vadd.f32 1e-05, %v813_v46  ;;  %v814_v38 = vmax.f32 %v782_v25, 0.0  ;;  %2981 = vmatmul.mubr.msk.f32.vlgmr.msra.gmra.mrb[0].mxu1 %vm454_vm3, %v1044_v21  ;;  %v3954_v3 = vmul.f32 0.03125, %v484_v26  ;;  %v751_v2 = vmul.f32 %v3949_v63, %v3949_v63 }
 0x192   :  { %v609_v24 = vpop.xlane.xlu0 %608  ;;  %v1013_v41 = vadd.f32 %v3934_v35, %v975_v29  ;;  %v976_v49 = vmul.f32 %v3921_v7, %v938_v36 }
 0x193   :  { %3136 = vrsqrt.f32 %v877_v37  ;;  %v878_v52 = vadd.f32 1e-05, %v814_v38  ;;  %v719_v33 = vmul.f32 0.03125, %v609_v24  ;;  %v752_v10 = vmul.f32 %v3954_v3, %v3954_v3 }
 0x194   :  { %v612_v59 = vpop.xlane.xlu1 %611  ;;  %v1045_v62 = vmax.f32 %v1013_v41, 0.0  ;;  %v1014_v45 = vadd.f32 %v3934_v35, %v976_v49  ;;  %v845_v49 = vsub.f32 %v3619_v27, %v3929_v31 }
 0x195   :  { %v3133_v9 = vpop.eup %3132  ;;  %3138 = vrsqrt.f32 %v878_v52  ;;  %v783_v40 = vsub.f32 %v719_v33, %v751_v2  ;;  %v720_v13 = vmul.f32 0.03125, %v612_v59 }
 0x196   :  { %2983 = vmatprep.mubr.msk.f32.mxu1 %vm454_vm3, %v1045_v62  ;;  %v487_v50 = vpop.xlane.xlu0 %486  ;;  %v1046_v51 = vmax.f32 %v1014_v45, 0.0  ;;  %v939_v19 = vmul.f32 %v3133_v9, %v843_v55  ;;  %v846_v9 = vsub.f32 %v3635_v34, %v3936_v42 }
 0x197   :  { %v3135_v12 = vpop.eup %3134  ;;  %v815_v47 = vmax.f32 %v783_v40, 0.0  ;;  %v784_v22 = vsub.f32 %v720_v13, %v752_v10  ;;  %v3968_v23 = vmul.f32 0.03125, %v487_v50 }
 0x198   :  { %v490_v46 = vpop.xlane.xlu1 %489  ;;  %2984 = vmatmul.mubr.msk.f32.gmra.mrb[2].mxu1 %vm454_vm3, %v1046_v51  ;;  %v977_v25 = vmul.f32 %v3921_v7, %v939_v19  ;;  %v940_v21 = vmul.f32 %v3135_v12, %v844_v16 }
 0x199   :  { %v879_v26 = vadd.f32 1e-05, %v815_v47  ;;  %v816_v29 = vmax.f32 %v784_v22, 0.0  ;;  %v3972_v36 = vmul.f32 0.03125, %v490_v46  ;;  %v753_v24 = vmul.f32 %v3968_v23, %v3968_v23 }
 0x19a   :  { %v615_v18 = vpop.xlane.xlu0 %614  ;;  %v1015_v61 = vadd.f32 %v3934_v35, %v977_v25  ;;  %v978_v37 = vmul.f32 %v3921_v7, %v940_v21 }
 0x19b   :  { %3140 = vrsqrt.f32 %v879_v26  ;;  %v880_v38 = vadd.f32 1e-05, %v816_v29  ;;  %v721_v41 = vmul.f32 0.03125, %v615_v18  ;;  %v754_v59 = vmul.f32 %v3972_v36, %v3972_v36 }
 0x19c   :  { %v618_v52 = vpop.xlane.xlu1 %617  ;;  %v1047_v2 = vmax.f32 %v1015_v61, 0.0  ;;  %v1016_v33 = vadd.f32 %v3934_v35, %v978_v37  ;;  %v847_v18 = vsub.f32 %v3656_v43, %v3949_v63 }
 0x19d   :  { %v3137_v55 = vpop.eup %3136  ;;  %3142 = vrsqrt.f32 %v880_v38  ;;  %v785_v62 = vsub.f32 %v721_v41, %v753_v24  ;;  %v722_v45 = vmul.f32 0.03125, %v618_v52 }
 0x19e   :  { %2986 = vmatprep.mubr.msk.f32.mxu1 %vm454_vm3, %v1047_v2  ;;  %v493_v10 = vpop.xlane.xlu0 %492  ;;  %v1048_v40 = vmax.f32 %v1016_v33, 0.0  ;;  %v941_v13 = vmul.f32 %v3137_v55, %v845_v49  ;;  %v848_v2 = vsub.f32 %v3672_v53, %v3954_v3 }
 0x19f   :  { %v3139_v27 = vpop.eup %3138  ;;  %v817_v31 = vmax.f32 %v785_v62, 0.0  ;;  %v786_v16 = vsub.f32 %v722_v45, %v754_v59  ;;  %v3986_v50 = vmul.f32 0.03125, %v493_v10 }
 0x1a0   :  { %v496_v51 = vpop.xlane.xlu1 %495  ;;  %2987 = vmatmul.mubr.msk.f32.gmra.mrb[4].mxu1 %vm454_vm3, %v1048_v40  ;;  %v979_v19 = vmul.f32 %v3921_v7, %v941_v13  ;;  %v942_v12 = vmul.f32 %v3139_v27, %v846_v9 }
 0x1a1   :  { %v881_v47 = vadd.f32 1e-05, %v817_v31  ;;  %v818_v22 = vmax.f32 %v786_v16, 0.0  ;;  %v3990_v46 = vmul.f32 0.03125, %v496_v51  ;;  %v755_v26 = vmul.f32 %v3986_v50, %v3986_v50 }
 0x1a2   :  { %v621_v34 = vpop.xlane.xlu0 %620  ;;  %v1017_v42 = vadd.f32 %v3934_v35, %v979_v19  ;;  %v980_v25 = vmul.f32 %v3921_v7, %v942_v12 }
 0x1a3   :  { %3144 = vrsqrt.f32 %v881_v47  ;;  %v882_v21 = vadd.f32 1e-05, %v818_v22  ;;  %v723_v29 = vmul.f32 0.03125, %v621_v34  ;;  %v756_v41 = vmul.f32 %v3990_v46, %v3990_v46 }
 0x1a4   :  { %v624_v61 = vpop.xlane.xlu1 %623  ;;  %v1049_v37 = vmax.f32 %v1017_v42, 0.0  ;;  %v1018_v38 = vadd.f32 %v3934_v35, %v980_v25  ;;  %v849_v47 = vsub.f32 %v3696_v1, %v3968_v23 }
 0x1a5   :  { %v3141_v24 = vpop.eup %3140  ;;  %3146 = vrsqrt.f32 %v882_v21  ;;  %v787_v49 = vsub.f32 %v723_v29, %v755_v26  ;;  %v724_v52 = vmul.f32 0.03125, %v624_v61 }
 0x1a6   :  { %2989 = vmatprep.mubr.msk.f32.mxu1 %vm454_vm3, %v1049_v37  ;;  %v499_v33 = vpop.xlane.xlu0 %498  ;;  %v1050_v55 = vmax.f32 %v1018_v38, 0.0  ;;  %v943_v59 = vmul.f32 %v3141_v24, %v847_v18  ;;  %v850_v18 = vsub.f32 %v3717_v11, %v3972_v36 }
 0x1a7   :  { %v3143_v43 = vpop.eup %3142  ;;  %v819_v63 = vmax.f32 %v787_v49, 0.0  ;;  %v788_v62 = vsub.f32 %v724_v52, %v756_v41  ;;  %v4004_v45 = vmul.f32 0.03125, %v499_v33 }
 0x1a8   :  { %v502_v9 = vpop.xlane.xlu1 %501  ;;  %2990 = vmatmul.mubr.msk.f32.gmra.mrb[6].mxu1 %vm454_vm3, %v1050_v55  ;;  %v981_v10 = vmul.f32 %v3921_v7, %v943_v59  ;;  %v944_v40 = vmul.f32 %v3143_v43, %v848_v2 }
 0x1a9   :  { %v883_v13 = vadd.f32 1e-05, %v819_v63  ;;  %v820_v27 = vmax.f32 %v788_v62, 0.0  ;;  %v4008_v31 = vmul.f32 0.03125, %v502_v9  ;;  %v757_v19 = vmul.f32 %v4004_v45, %v4004_v45 }
 0x1aa   :  { %v627_v53 = vpop.xlane.xlu0 %626  ;;  %v1019_v3 = vadd.f32 %v3934_v35, %v981_v10  ;;  %v982_v16 = vmul.f32 %v3921_v7, %v944_v40  ;;  %v851_v10 = vsub.f32 %v3747_v28, %v3986_v50 }
 0x1ab   :  { %3148 = vrsqrt.f32 %v883_v13  ;;  %v884_v51 = vadd.f32 1e-05, %v820_v27  ;;  %v725_v12 = vmul.f32 0.03125, %v627_v53  ;;  %v758_v21 = vmul.f32 %v4008_v31, %v4008_v31 }
 0x1ac   :  { %v630_v22 = vpop.xlane.xlu1 %629  ;;  %v1051_v34 = vmax.f32 %v1019_v3, 0.0  ;;  %v1020_v42 = vadd.f32 %v3934_v35, %v982_v16 }
 0x1ad   :  { %v3145_v25 = vpop.eup %3144  ;;  %3150 = vrsqrt.f32 %v884_v51  ;;  %v789_v26 = vsub.f32 %v725_v12, %v757_v19  ;;  %v726_v29 = vmul.f32 0.03125, %v630_v22  ;;  %v852_v19 = vsub.f32 %v3769_v39, %v3990_v46 }
 0x1ae   :  { %2992 = vmatprep.mubr.msk.f32.mxu1 %vm454_vm3, %v1051_v34  ;;  %v505_v61 = vpop.xlane.xlu0 %504  ;;  %v1052_v37 = vmax.f32 %v1020_v42, 0.0  ;;  %v945_v38 = vmul.f32 %v3145_v25, %v849_v47 }
 0x1af   :  { %v3147_v1 = vpop.eup %3146  ;;  %v821_v23 = vmax.f32 %v789_v26, 0.0  ;;  %v790_v24 = vsub.f32 %v726_v29, %v758_v21  ;;  %v4022_v41 = vmul.f32 0.03125, %v505_v61 }
 0x1b0   :  { %v508_v49 = vpop.xlane.xlu1 %507  ;;  %2993 = vmatmul.mubr.msk.f32.gmra.mrb[8].mxu1 %vm454_vm3, %v1052_v37  ;;  %v983_v52 = vmul.f32 %v3921_v7, %v945_v38  ;;  %v946_v2 = vmul.f32 %v3147_v1, %v850_v18 }
 0x1b1   :  { %v885_v33 = vadd.f32 1e-05, %v821_v23  ;;  %v822_v55 = vmax.f32 %v790_v24, 0.0  ;;  %v4026_v59 = vmul.f32 0.03125, %v508_v49  ;;  %v759_v62 = vmul.f32 %v4022_v41, %v4022_v41 }
 0x1b2   :  { %v633_v11 = vpop.xlane.xlu0 %632  ;;  %v1021_v36 = vadd.f32 %v3934_v35, %v983_v52  ;;  %v984_v43 = vmul.f32 %v3921_v7, %v946_v2  ;;  %v853_v24 = vsub.f32 %v3787_v54, %v4004_v45 }
 0x1b3   :  { %3152 = vrsqrt.f32 %v885_v33  ;;  %v886_v63 = vadd.f32 1e-05, %v822_v55  ;;  %v727_v9 = vmul.f32 0.03125, %v633_v11  ;;  %v760_v3 = vmul.f32 %v4026_v59, %v4026_v59 }
 0x1b4   :  { %v636_v40 = vpop.xlane.xlu1 %635  ;;  %v1053_v13 = vmax.f32 %v1021_v36, 0.0  ;;  %v1022_v27 = vadd.f32 %v3934_v35, %v984_v43  ;;  %v854_v43 = vsub.f32 %v3800_v0, %v4008_v31 }
 0x1b5   :  { %v3149_v53 = vpop.eup %3148  ;;  %3154 = vrsqrt.f32 %v886_v63  ;;  %v791_v16 = vsub.f32 %v727_v9, %v759_v62  ;;  %v728_v51 = vmul.f32 0.03125, %v636_v40 }
 0x1b6   :  { %2995 = vmatprep.mubr.msk.f32.mxu1 %vm454_vm3, %v1053_v13  ;;  %v511_v12 = vpop.xlane.xlu0 %510  ;;  %v1054_v47 = vmax.f32 %v1022_v27, 0.0  ;;  %v947_v22 = vmul.f32 %v3149_v53, %v851_v10 }
 0x1b7   :  { %v3151_v28 = vpop.eup %3150  ;;  %v823_v50 = vmax.f32 %v791_v16, 0.0  ;;  %v792_v34 = vsub.f32 %v728_v51, %v760_v3  ;;  %v4040_v42 = vmul.f32 0.03125, %v511_v12 }
 0x1b8   :  { %v514_v25 = vpop.xlane.xlu1 %513  ;;  %2996 = vmatmul.mubr.msk.f32.gmra.mrb[10].mxu1 %vm454_vm3, %v1054_v47  ;;  %v985_v21 = vmul.f32 %v3921_v7, %v947_v22  ;;  %v948_v26 = vmul.f32 %v3151_v28, %v852_v19  ;;  %v855_v28 = vsub.f32 %v3682_v58, %v4022_v41 }
 0x1b9   :  { %v887_v29 = vadd.f32 1e-05, %v823_v50  ;;  %v824_v18 = vmax.f32 %v792_v34, 0.0  ;;  %v4044_v61 = vmul.f32 0.03125, %v514_v25  ;;  %v761_v1 = vmul.f32 %v4040_v42, %v4040_v42 }
 0x1ba   :  { %v639_v39 = vpop.xlane.xlu0 %638  ;;  %v1023_v46 = vadd.f32 %v3934_v35, %v985_v21  ;;  %v986_v37 = vmul.f32 %v3921_v7, %v948_v26 }
 0x1bb   :  { %3156 = vrsqrt.f32 %v887_v29  ;;  %v888_v38 = vadd.f32 1e-05, %v824_v18  ;;  %v729_v23 = vmul.f32 0.03125, %v639_v39  ;;  %v762_v55 = vmul.f32 %v4044_v61, %v4044_v61 }
 0x1bc   :  { %v642_v49 = vpop.xlane.xlu1 %641  ;;  %v1055_v52 = vmax.f32 %v1023_v46, 0.0  ;;  %v1024_v2 = vadd.f32 %v3934_v35, %v986_v37  ;;  %v856_v39 = vsub.f32 %v3678_v56, %v4026_v59 }
 0x1bd   :  { %v3153_v33 = vpop.eup %3152  ;;  %3158 = vrsqrt.f32 %v888_v38  ;;  %v793_v11 = vsub.f32 %v729_v23, %v761_v1  ;;  %v730_v36 = vmul.f32 0.03125, %v642_v49 }
 0x1be   :  { %2998 = vmatprep.mubr.msk.f32.mxu1 %vm454_vm3, %v1055_v52  ;;  %v517_v63 = vpop.xlane.xlu0 %516  ;;  %v1056_v62 = vmax.f32 %v1024_v2, 0.0  ;;  %v949_v9 = vmul.f32 %v3153_v33, %v853_v24 }
 0x1bf   :  { %v3155_v54 = vpop.eup %3154  ;;  %v825_v45 = vmax.f32 %v793_v11, 0.0  ;;  %v794_v10 = vsub.f32 %v730_v36, %v762_v55  ;;  %v4058_v40 = vmul.f32 0.03125, %v517_v63 }
 0x1c0   :  { %v520_v13 = vpop.xlane.xlu1 %519  ;;  %2999 = vmatmul.mubr.msk.f32.gmra.mrb[12].mxu1 %vm454_vm3, %v1056_v62  ;;  %v987_v27 = vmul.f32 %v3921_v7, %v949_v9  ;;  %v950_v53 = vmul.f32 %v3155_v54, %v854_v43  ;;  %v857_v62 = vsub.f32 %v3705_v6, %v4040_v42 }
 0x1c1   :  { %v889_v3 = vadd.f32 1e-05, %v825_v45  ;;  %v826_v16 = vmax.f32 %v794_v10, 0.0  ;;  %v4062_v51 = vmul.f32 0.03125, %v520_v13  ;;  %v763_v47 = vmul.f32 %v4058_v40, %v4058_v40 }
 0x1c2   :  { %v645_v0 = vpop.xlane.xlu0 %644  ;;  %v1025_v31 = vadd.f32 %v3934_v35, %v987_v27  ;;  %v988_v19 = vmul.f32 %v3921_v7, %v950_v53 }
 0x1c3   :  { %3160 = vrsqrt.f32 %v889_v3  ;;  %v890_v12 = vadd.f32 1e-05, %v826_v16  ;;  %v731_v22 = vmul.f32 0.03125, %v645_v0  ;;  %v764_v26 = vmul.f32 %v4062_v51, %v4062_v51 }
 0x1c4   :  { %v648_v50 = vpop.xlane.xlu1 %647  ;;  %v1057_v34 = vmax.f32 %v1025_v31, 0.0  ;;  %v1026_v25 = vadd.f32 %v3934_v35, %v988_v19  ;;  %v858_v3 = vsub.f32 %v3701_v4, %v4044_v61 }
 0x1c5   :  { %v3157_v21 = vpop.eup %3156  ;;  %3162 = vrsqrt.f32 %v890_v12  ;;  %v795_v29 = vsub.f32 %v731_v22, %v763_v47  ;;  %v732_v18 = vmul.f32 0.03125, %v648_v50 }
 0x1c6   :  { %3001 = vmatprep.mubr.msk.f32.mxu1 %vm454_vm3, %v1057_v34  ;;  %v523_v46 = vpop.xlane.xlu0 %522  ;;  %v1058_v37 = vmax.f32 %v1026_v25, 0.0  ;;  %v951_v38 = vmul.f32 %v3157_v21, %v855_v28 }
 0x1c7   :  { %v3159_v58 = vpop.eup %3158  ;;  %v827_v41 = vmax.f32 %v795_v29, 0.0  ;;  %v796_v1 = vsub.f32 %v732_v18, %v764_v26  ;;  %v4076_v23 = vmul.f32 0.03125, %v523_v46 }
 0x1c8   :  { %v526_v24 = vpop.xlane.xlu1 %525  ;;  %3002 = vmatmul.mubr.msk.f32.gmra.mrb[14].mxu1 %vm454_vm3, %v1058_v37  ;;  %v989_v49 = vmul.f32 %v3921_v7, %v951_v38  ;;  %v952_v52 = vmul.f32 %v3159_v58, %v856_v39  ;;  %v859_v39 = vsub.f32 %v3733_v20, %v4058_v40 }
 0x1c9   :  { %v891_v2 = vadd.f32 1e-05, %v827_v41  ;;  %v828_v33 = vmax.f32 %v796_v1, 0.0  ;;  %v4080_v55 = vmul.f32 0.03125, %v526_v24  ;;  %v765_v43 = vmul.f32 %v4076_v23, %v4076_v23 }
 0x1ca   :  { %v651_v56 = vpop.xlane.xlu0 %650  ;;  %v1027_v59 = vadd.f32 %v3934_v35, %v989_v49  ;;  %v990_v11 = vmul.f32 %v3921_v7, %v952_v52  ;;  %v860_v49 = vsub.f32 %v3723_v15, %v4062_v51 }
 0x1cb   :  { %3164 = vrsqrt.f32 %v891_v2  ;;  %v892_v36 = vadd.f32 1e-05, %v828_v33  ;;  %v733_v63 = vmul.f32 0.03125, %v651_v56  ;;  %v766_v13 = vmul.f32 %v4080_v55, %v4080_v55 }
 0x1cc   :  { %v654_v9 = vpop.xlane.xlu1 %653  ;;  %v1059_v54 = vmax.f32 %v1027_v59, 0.0  ;;  %v1028_v45 = vadd.f32 %v3934_v35, %v990_v11 }
 0x1cd   :  { %v3161_v10 = vpop.eup %3160  ;;  %3166 = vrsqrt.f32 %v892_v36  ;;  %v797_v27 = vsub.f32 %v733_v63, %v765_v43  ;;  %v734_v53 = vmul.f32 0.03125, %v654_v9 }
 0x1ce   :  { %3004 = vmatprep.mubr.msk.f32.mxu1 %vm454_vm3, %v1059_v54  ;;  %v529_v16 = vpop.xlane.xlu0 %528  ;;  %v1060_v0 = vmax.f32 %v1028_v45, 0.0  ;;  %v953_v31 = vmul.f32 %v3161_v10, %v857_v62 }
 0x1cf   :  { %v3163_v6 = vpop.eup %3162  ;;  %v829_v42 = vmax.f32 %v797_v27, 0.0  ;;  %v798_v19 = vsub.f32 %v734_v53, %v766_v13  ;;  %v4094_v12 = vmul.f32 0.03125, %v529_v16  ;;  %v861_v27 = vsub.f32 %v3756_v32, %v4076_v23 }
 0x1d0   :  { %v532_v47 = vpop.xlane.xlu1 %531  ;;  %3005 = vmatmul.mubr.msk.f32.gmra.mrb[16].mxu1 %vm454_vm3, %v1060_v0  ;;  %v991_v22 = vmul.f32 %v3921_v7, %v953_v31  ;;  %v954_v28 = vmul.f32 %v3163_v6, %v858_v3 }
 0x1d1   :  { %v893_v50 = vadd.f32 1e-05, %v829_v42  ;;  %v830_v34 = vmax.f32 %v798_v19, 0.0  ;;  %v4098_v25 = vmul.f32 0.03125, %v532_v47  ;;  %v767_v29 = vmul.f32 %v4094_v12, %v4094_v12 }
 0x1d2   :  { %v657_v4 = vpop.xlane.xlu0 %656  ;;  %v1029_v61 = vadd.f32 %v3934_v35, %v991_v22  ;;  %v992_v21 = vmul.f32 %v3921_v7, %v954_v28  ;;  %v862_v19 = vsub.f32 %v3752_v30, %v4080_v55 }
 0x1d3   :  { %3168 = vrsqrt.f32 %v893_v50  ;;  %v894_v26 = vadd.f32 1e-05, %v830_v34  ;;  %v735_v18 = vmul.f32 0.03125, %v657_v4  ;;  %v768_v41 = vmul.f32 %v4098_v25, %v4098_v25 }
 0x1d4   :  { %v660_v46 = vpop.xlane.xlu1 %659  ;;  %v1061_v37 = vmax.f32 %v1029_v61, 0.0  ;;  %v1030_v38 = vadd.f32 %v3934_v35, %v992_v21 }
 0x1d5   :  { %v3165_v58 = vpop.eup %3164  ;;  %3170 = vrsqrt.f32 %v894_v26  ;;  %v799_v1 = vsub.f32 %v735_v18, %v767_v29  ;;  %v736_v24 = vmul.f32 0.03125, %v660_v46 }
 0x1d6   :  { %3007 = vmatprep.mubr.msk.f32.mxu1 %vm454_vm3, %v1061_v37  ;;  %v535_v52 = vpop.xlane.xlu0 %534  ;;  %v1062_v2 = vmax.f32 %v1030_v38, 0.0  ;;  %v955_v33 = vmul.f32 %v3165_v58, %v859_v39  ;;  %v863_v58 = vsub.f32 %v3778_v48, %v4094_v12 }
 0x1d7   :  { %v3167_v20 = vpop.eup %3166  ;;  %v831_v40 = vmax.f32 %v799_v1, 0.0  ;;  %v800_v56 = vsub.f32 %v736_v24, %v768_v41  ;;  %v4112_v59 = vmul.f32 0.03125, %v535_v52 }
 0x1d8   :  { %v538_v11 = vpop.xlane.xlu1 %537  ;;  %3008 = vmatmul.mubr.msk.f32.gmra.mrb[18].mxu1 %vm454_vm3, %v1062_v2  ;;  %v993_v36 = vmul.f32 %v3921_v7, %v955_v33  ;;  %v956_v43 = vmul.f32 %v3167_v20, %v860_v49  ;;  %v864_v20 = vsub.f32 %v3775_v44, %v4098_v25 }
 0x1d9   :  { %v895_v63 = vadd.f32 1e-05, %v831_v40  ;;  %v832_v62 = vmax.f32 %v800_v56, 0.0  ;;  %v4116_v9 = vmul.f32 0.03125, %v538_v11  ;;  %v769_v10 = vmul.f32 %v4112_v59, %v4112_v59 }
 0x1da   :  { %v663_v15 = vpop.xlane.xlu0 %662  ;;  %v1031_v51 = vadd.f32 %v3934_v35, %v993_v36  ;;  %v994_v54 = vmul.f32 %v3921_v7, %v956_v43 }
 0x1db   :  { %3172 = vrsqrt.f32 %v895_v63  ;;  %v896_v45 = vadd.f32 1e-05, %v832_v62  ;;  %v737_v13 = vmul.f32 0.03125, %v663_v15  ;;  %v770_v31 = vmul.f32 %v4116_v9, %v4116_v9 }
 0x1dc   :  { %v666_v53 = vpop.xlane.xlu1 %665  ;;  %v1063_v3 = vmax.f32 %v1031_v51, 0.0  ;;  %v1032_v16 = vadd.f32 %v3934_v35, %v994_v54 }
 0x1dd   :  { %v3169_v0 = vpop.eup %3168  ;;  %3174 = vrsqrt.f32 %v896_v45  ;;  %v801_v6 = vsub.f32 %v737_v13, %v769_v10  ;;  %v738_v42 = vmul.f32 0.03125, %v666_v53 }
 0x1de   :  { %3010 = vmatprep.mubr.msk.f32.mxu1 %vm454_vm3, %v1063_v3  ;;  %v541_v47 = vpop.xlane.xlu0 %540  ;;  %v1064_v22 = vmax.f32 %v1032_v16, 0.0  ;;  %v957_v28 = vmul.f32 %v3169_v0, %v861_v27  ;;  %v865_v3 = vsub.f32 %v3795_v60, %v4112_v59 }
 0x1df   :  { %v3171_v32 = vpop.eup %3170  ;;  %v833_v23 = vmax.f32 %v801_v6, 0.0  ;;  %v802_v50 = vsub.f32 %v738_v42, %v770_v31  ;;  %v4130_v34 = vmul.f32 0.03125, %v541_v47 }
 0x1e0   :  { %v544_v4 = vpop.xlane.xlu1 %543  ;;  %3011 = vmatmul.mubr.msk.f32.gmra.mrb[20].mxu1 %vm454_vm3, %v1064_v22  ;;  %v995_v61 = vmul.f32 %v3921_v7, %v957_v28  ;;  %v958_v21 = vmul.f32 %v3171_v32, %v862_v19  ;;  %v866_v22 = vsub.f32 %v3792_v57, %v4116_v9 }
 0x1e1   :  { %v897_v26 = vadd.f32 1e-05, %v833_v23  ;;  %v834_v29 = vmax.f32 %v802_v50, 0.0  ;;  %v4134_v18 = vmul.f32 0.03125, %v544_v4  ;;  %v771_v37 = vmul.f32 %v4130_v34, %v4130_v34 }
 0x1e2   :  { %v669_v30 = vpop.xlane.xlu0 %668  ;;  %v1033_v55 = vadd.f32 %v3934_v35, %v995_v61  ;;  %v996_v39 = vmul.f32 %v3921_v7, %v958_v21  ;;  %v867_v9 = vsub.f32 %v3809_v8, %v4130_v34 }
 0x1e3   :  { %3176 = vrsqrt.f32 %v897_v26  ;;  %v898_v46 = vadd.f32 1e-05, %v834_v29  ;;  %v739_v38 = vmul.f32 0.03125, %v669_v30  ;;  %v772_v52 = vmul.f32 %v4134_v18, %v4134_v18 }
 0x1e4   :  { %v672_v41 = vpop.xlane.xlu1 %671  ;;  %v1065_v1 = vmax.f32 %v1033_v55, 0.0  ;;  %v1034_v24 = vadd.f32 %v3934_v35, %v996_v39 }
 0x1e5   :  { %v3173_v49 = vpop.eup %3172  ;;  %3178 = vrsqrt.f32 %v898_v46  ;;  %v803_v2 = vsub.f32 %v739_v38, %v771_v37  ;;  %v740_v33 = vmul.f32 0.03125, %v672_v41  ;;  %v868_v46 = vsub.f32 %v3806_v5, %v4134_v18 }
 0x1e6   :  { %3013 = vmatprep.mubr.msk.f32.mxu1 %vm454_vm3, %v1065_v1  ;;  %v547_v40 = vpop.xlane.xlu0 %546  ;;  %v1066_v56 = vmax.f32 %v1034_v24, 0.0  ;;  %v959_v11 = vmul.f32 %v3173_v49, %v863_v58 }
 0x1e7   :  { %v3175_v48 = vpop.eup %3174  ;;  %v835_v12 = vmax.f32 %v803_v2, 0.0  ;;  %v804_v36 = vsub.f32 %v740_v33, %v772_v52  ;;  %v4148_v43 = vmul.f32 0.03125, %v547_v40 }
 0x1e8   :  { %v550_v63 = vpop.xlane.xlu1 %549  ;;  %3014 = vmatmul.mubr.msk.f32.gmra.mrb[22].mxu1 %vm454_vm3, %v1066_v56  ;;  %v997_v62 = vmul.f32 %v3921_v7, %v959_v11  ;;  %v960_v15 = vmul.f32 %v3175_v48, %v864_v20 }
 0x1e9   :  { %v899_v51 = vadd.f32 1e-05, %v835_v12  ;;  %v836_v54 = vmax.f32 %v804_v36, 0.0  ;;  %v710_v45 = vmul.f32 0.03125, %v550_v63  ;;  %v773_v27 = vmul.f32 %v4148_v43, %v4148_v43  ;;  %v4191_v36 = vld [vmem:[%s4878_s8] ss:$0 sm:$0xff] }
 0x1ea   :  { %v675_v44 = vpop.xlane.xlu0 %674  ;;  %v1035_v25 = vadd.f32 %v3934_v35, %v997_v62  ;;  %v998_v10 = vmul.f32 %v3921_v7, %v960_v15  ;;  %v869_v24 = vsub.f32 %v3821_v17, %v4148_v43 }
 0x1eb   :  { %3180 = vrsqrt.f32 %v899_v51  ;;  %v900_v13 = vadd.f32 1e-05, %v836_v54  ;;  %v741_v53 = vmul.f32 0.03125, %v675_v44  ;;  %v774_v42 = vmul.f32 %v710_v45, %v710_v45 }
 0x1ec   :  { %v678_v16 = vpop.xlane.xlu1 %677  ;;  %v1067_v0 = vmax.f32 %v1035_v25, 0.0  ;;  %v1036_v31 = vadd.f32 %v3934_v35, %v998_v10  ;;  %v870_v52 = vsub.f32 %v3818_v14, %v710_v45 }
 0x1ed   :  { %v3177_v6 = vpop.eup %3176  ;;  %3182 = vrsqrt.f32 %v900_v13  ;;  %v805_v19 = vsub.f32 %v741_v53, %v773_v27  ;;  %v742_v47 = vmul.f32 0.03125, %v678_v16 }
 0x1ee   :  { %3016 = vmatprep.mubr.msk.f32.mxu1 %vm454_vm3, %v1067_v0  ;;  %v1068_v28 = vmax.f32 %v1036_v31, 0.0  ;;  %v961_v32 = vmul.f32 %v3177_v6, %v865_v3 }
 0x1ef   :  { %v3179_v23 = vpop.eup %3178  ;;  %v837_v50 = vmax.f32 %v805_v19, 0.0  ;;  %v806_v4 = vsub.f32 %v742_v47, %v774_v42 }
 0x1f0   :  { %3017 = vmatmul.mubr.msk.f32.gmra.mrb[24].mxu1 %vm454_vm3, %v1068_v28  ;;  %v999_v60 = vmul.f32 %v3921_v7, %v961_v32  ;;  %v962_v59 = vmul.f32 %v3179_v23, %v866_v22 }
 0x1f1   :  { %v901_v61 = vadd.f32 1e-05, %v837_v50  ;;  %v838_v21 = vmax.f32 %v806_v4, 0.0 }
 0x1f2   :  { %v1037_v26 = vadd.f32 %v3934_v35, %v999_v60  ;;  %v1000_v29 = vmul.f32 %v3921_v7, %v962_v59 }
 0x1f3   :  { %3184 = vrsqrt.f32 %v901_v61  ;;  %v902_v57 = vadd.f32 1e-05, %v838_v21 }
 0x1f4   :  { %v1069_v30 = vmax.f32 %v1037_v26, 0.0  ;;  %v1038_v55 = vadd.f32 %v3934_v35, %v1000_v29 }
 0x1f5   :  { %v3181_v39 = vpop.eup %3180  ;;  %3186 = vrsqrt.f32 %v902_v57 }
 0x1f6   :  { %3019 = vmatprep.mubr.msk.f32.mxu1 %vm454_vm3, %v1069_v30  ;;  %v1070_v37 = vmax.f32 %v1038_v55, 0.0  ;;  %v963_v38 = vmul.f32 %v3181_v39, %v867_v9 }
 0x1f7   :  { %v3183_v58 = vpop.eup %3182 }
 0x1f8   :  { %3020 = vmatmul.mubr.msk.f32.gmra.mrb[26].mxu1 %vm454_vm3, %v1070_v37  ;;  %v1001_v41 = vmul.f32 %v3921_v7, %v963_v38  ;;  %v964_v1 = vmul.f32 %v3183_v58, %v868_v46 }
 0x1fa   :  { %v1039_v8 = vadd.f32 %v3934_v35, %v1001_v41  ;;  %v1002_v34 = vmul.f32 %v3921_v7, %v964_v1 }
 0x1fc   :  { %v1071_v49 = vmax.f32 %v1039_v8, 0.0  ;;  %v1040_v5 = vadd.f32 %v3934_v35, %v1002_v34 }
 0x1fd   :  { %v3185_v18 = vpop.eup %3184 }
 0x1fe   :  { %3022 = vmatprep.mubr.msk.f32.mxu1 %vm454_vm3, %v1071_v49  ;;  %v1072_v2 = vmax.f32 %v1040_v5, 0.0  ;;  %v965_v33 = vmul.f32 %v3185_v18, %v869_v24 }
 0x1ff   :  { %v3187_v20 = vpop.eup %3186 }
 0x200   :  { %3023 = vmatmul.mubr.msk.f32.gmra.mrb[28].mxu1 %vm454_vm3, %v1072_v2  ;;  %v1003_v40 = vmul.f32 %v3921_v7, %v965_v33  ;;  %v966_v56 = vmul.f32 %v3187_v20, %v870_v52 }
 0x202   :  { %v1041_v11 = vadd.f32 %v3934_v35, %v1003_v40  ;;  %v1004_v17 = vmul.f32 %v3921_v7, %v966_v56 }
 0x204   :  { %v1073_v48 = vmax.f32 %v1041_v11, 0.0  ;;  %v1042_v12 = vadd.f32 %v3934_v35, %v1004_v17 }
 0x206   :  { %3025 = vmatprep.mubr.msk.f32.mxu1 %vm454_vm3, %v1073_v48  ;;  %v1074_v14 = vmax.f32 %v1042_v12, 0.0 }
 0x208   :  { %3026 = vmatmul.mubr.msk.f32.gmra.mrb[30].mxu1 %vm454_vm3, %v1074_v14 }
 0x264   :  { %v2982_v43 = vpop.f32.mrb[0].mxu1 }
 0x265   :  { %v4194_v63 = vadd.f32 %v2982_v43, %v4191_v36  ;;  %v1563_v62 = vpop.f32.mrb[1].mxu1 }
 0x266   :  { %v4197_v7 = vadd.f32 %v4191_v36, %v1563_v62 }
 0x267   :  { %v1764_v35 = vsel %vm1760_vm4, %v4194_v63, 0.0  ;;  %v1858_v15 = vmul.f32 %v4194_v63, %v4194_v63 }
 0x268   :  { %1765 = vadd.xlane.f32.xlu1 %v1764_v35  ;;  %v1761_v51 = vsel %vm1760_vm4, %v4197_v7, 0.0  ;;  %v1857_v54 = vmul.f32 %v4197_v7, %v4197_v7 }
 0x269   :  { %1762 = vadd.xlane.f32.xlu0 %v1761_v51  ;;  %v1892_v44 = vsel %vm1760_vm4, %v1858_v15, 0.0 }
 0x26a   :  { %v1889_v13 = vsel %vm1760_vm4, %v1857_v54, 0.0 }
 0x26b   :  { %v2985_v45 = vpop.f32.mrb[2].mxu1 }
 0x26c   :  { %v4209_v25 = vadd.f32 %v2985_v45, %v4191_v36  ;;  %1893 = vadd.xlane.f32.xlu1 %v1892_v44  ;;  %v1573_v10 = vpop.f32.mrb[3].mxu1 }
 0x26d   :  { %v4213_v27 = vadd.f32 %v4191_v36, %v1573_v10  ;;  %1890 = vadd.xlane.f32.xlu0 %v1889_v13 }
 0x26e   :  { %v1770_v53 = vsel %vm1760_vm4, %v4209_v25, 0.0  ;;  %v1860_v16 = vmul.f32 %v4209_v25, %v4209_v25 }
 0x26f   :  { %v1767_v3 = vsel %vm1760_vm4, %v4213_v27, 0.0  ;;  %v1859_v0 = vmul.f32 %v4213_v27, %v4213_v27 }
 0x270   :  { %1771 = vadd.xlane.f32.xlu1 %v1770_v53  ;;  %v1898_v6 = vsel %vm1760_vm4, %v1860_v16, 0.0 }
 0x271   :  { %1768 = vadd.xlane.f32.xlu0 %v1767_v3  ;;  %v1895_v47 = vsel %vm1760_vm4, %v1859_v0, 0.0 }
 0x273   :  { %v2988_v31 = vpop.f32.mrb[4].mxu1 }
 0x274   :  { %v4225_v42 = vadd.f32 %v2988_v31, %v4191_v36  ;;  %1899 = vadd.xlane.f32.xlu1 %v1898_v6  ;;  %v1583_v19 = vpop.f32.mrb[5].mxu1 }
 0x275   :  { %v4229_v22 = vadd.f32 %v4191_v36, %v1583_v19  ;;  %1896 = vadd.xlane.f32.xlu0 %v1895_v47 }
 0x276   :  { %v1776_v28 = vsel %vm1760_vm4, %v4225_v42, 0.0  ;;  %v1862_v23 = vmul.f32 %v4225_v42, %v4225_v42 }
 0x277   :  { %v1773_v32 = vsel %vm1760_vm4, %v4229_v22, 0.0  ;;  %v1861_v50 = vmul.f32 %v4229_v22, %v4229_v22 }
 0x278   :  { %1777 = vadd.xlane.f32.xlu1 %v1776_v28  ;;  %v1904_v60 = vsel %vm1760_vm4, %v1862_v23, 0.0 }
 0x279   :  { %1774 = vadd.xlane.f32.xlu0 %v1773_v32  ;;  %v1901_v21 = vsel %vm1760_vm4, %v1861_v50, 0.0 }
 0x27b   :  { %v2991_v4 = vpop.f32.mrb[6].mxu1 }
 0x27c   :  { %v4241_v59 = vadd.f32 %v2991_v4, %v4191_v36  ;;  %1905 = vadd.xlane.f32.xlu1 %v1904_v60  ;;  %v1593_v61 = vpop.f32.mrb[7].mxu1 }
 0x27d   :  { %v4245_v26 = vadd.f32 %v4191_v36, %v1593_v61  ;;  %1902 = vadd.xlane.f32.xlu0 %v1901_v21 }
 0x27e   :  { %v1782_v29 = vsel %vm1760_vm4, %v4241_v59, 0.0  ;;  %v1864_v9 = vmul.f32 %v4241_v59, %v4241_v59 }
 0x27f   :  { %v1779_v57 = vsel %vm1760_vm4, %v4245_v26, 0.0  ;;  %v1863_v30 = vmul.f32 %v4245_v26, %v4245_v26 }
 0x280   :  { %1783 = vadd.xlane.f32.xlu1 %v1782_v29  ;;  %v1910_v39 = vsel %vm1760_vm4, %v1864_v9, 0.0 }
 0x281   :  { %1780 = vadd.xlane.f32.xlu0 %v1779_v57  ;;  %v1907_v38 = vsel %vm1760_vm4, %v1863_v30, 0.0 }
 0x283   :  { %v2994_v55 = vpop.f32.mrb[8].mxu1 }
 0x284   :  { %v4257_v46 = vadd.f32 %v2994_v55, %v4191_v36  ;;  %1911 = vadd.xlane.f32.xlu1 %v1910_v39  ;;  %v1603_v37 = vpop.f32.mrb[9].mxu1 }
 0x285   :  { %v4261_v58 = vadd.f32 %v4191_v36, %v1603_v37  ;;  %1908 = vadd.xlane.f32.xlu0 %v1907_v38 }
 0x286   :  { %v1788_v41 = vsel %vm1760_vm4, %v4257_v46, 0.0  ;;  %v1866_v8 = vmul.f32 %v4257_v46, %v4257_v46 }
 0x287   :  { %v1785_v1 = vsel %vm1760_vm4, %v4261_v58, 0.0  ;;  %v1865_v34 = vmul.f32 %v4261_v58, %v4261_v58 }
 0x288   :  { %1789 = vadd.xlane.f32.xlu1 %v1788_v41  ;;  %v1916_v49 = vsel %vm1760_vm4, %v1866_v8, 0.0 }
 0x289   :  { %1786 = vadd.xlane.f32.xlu0 %v1785_v1  ;;  %v1913_v52 = vsel %vm1760_vm4, %v1865_v34, 0.0 }
 0x28b   :  { %v2997_v24 = vpop.f32.mrb[10].mxu1 }
 0x28c   :  { %v4273_v5 = vadd.f32 %v2997_v24, %v4191_v36  ;;  %1917 = vadd.xlane.f32.xlu1 %v1916_v49  ;;  %v1613_v18 = vpop.f32.mrb[11].mxu1 }
 0x28d   :  { %v4277_v2 = vadd.f32 %v4191_v36, %v1613_v18  ;;  %1914 = vadd.xlane.f32.xlu0 %v1913_v52 }
 0x28e   :  { %v1794_v33 = vsel %vm1760_vm4, %v4273_v5, 0.0  ;;  %v1868_v40 = vmul.f32 %v4273_v5, %v4273_v5 }
 0x28f   :  { %v1791_v20 = vsel %vm1760_vm4, %v4277_v2, 0.0  ;;  %v1867_v56 = vmul.f32 %v4277_v2, %v4277_v2 }
 0x290   :  { %1795 = vadd.xlane.f32.xlu1 %v1794_v33  ;;  %v1922_v17 = vsel %vm1760_vm4, %v1868_v40, 0.0 }
 0x291   :  { %1792 = vadd.xlane.f32.xlu0 %v1791_v20  ;;  %v1919_v14 = vsel %vm1760_vm4, %v1867_v56, 0.0 }
 0x293   :  { %v3000_v11 = vpop.f32.mrb[12].mxu1 }
 0x294   :  { %v4289_v48 = vadd.f32 %v3000_v11, %v4191_v36  ;;  %1923 = vadd.xlane.f32.xlu1 %v1922_v17  ;;  %v1623_v12 = vpop.f32.mrb[13].mxu1 }
 0x295   :  { %v4293_v43 = vadd.f32 %v4191_v36, %v1623_v12  ;;  %1920 = vadd.xlane.f32.xlu0 %v1919_v14 }
 0x296   :  { %v1800_v62 = vsel %vm1760_vm4, %v4289_v48, 0.0  ;;  %v1870_v15 = vmul.f32 %v4289_v48, %v4289_v48 }
 0x297   :  { %v1797_v35 = vsel %vm1760_vm4, %v4293_v43, 0.0  ;;  %v1869_v51 = vmul.f32 %v4293_v43, %v4293_v43 }
 0x298   :  { %1801 = vadd.xlane.f32.xlu1 %v1800_v62  ;;  %v1928_v45 = vsel %vm1760_vm4, %v1870_v15, 0.0 }
 0x299   :  { %1798 = vadd.xlane.f32.xlu0 %v1797_v35  ;;  %v1925_v13 = vsel %vm1760_vm4, %v1869_v51, 0.0 }
 0x29b   :  { %v3003_v54 = vpop.f32.mrb[14].mxu1 }
 0x29c   :  { %v4305_v44 = vadd.f32 %v3003_v54, %v4191_v36  ;;  %1929 = vadd.xlane.f32.xlu1 %v1928_v45  ;;  %v1633_v10 = vpop.f32.mrb[15].mxu1 }
 0x29d   :  { %v4309_v53 = vadd.f32 %v4191_v36, %v1633_v10  ;;  %1926 = vadd.xlane.f32.xlu0 %v1925_v13 }
 0x29e   :  { %4890 = vst [vmem:[#allocation6_spill] sm:$0xff] %v4305_v44  ;;  %v1806_v3 = vsel %vm1760_vm4, %v4305_v44, 0.0 }
 0x29f   :  { %4891 = vst [vmem:[#allocation7_spill] sm:$0xff] %v4309_v53  ;;  %v1803_v16 = vsel %vm1760_vm4, %v4309_v53, 0.0 }
 0x2a0   :  { %1807 = vadd.xlane.f32.xlu1 %v1806_v3 }
 0x2a1   :  { %1804 = vadd.xlane.f32.xlu0 %v1803_v16 }
 0x2a3   :  { %v3006_v0 = vpop.f32.mrb[16].mxu1 }
 0x2a4   :  { %v4316_v31 = vadd.f32 %v3006_v0, %v4191_v36  ;;  %v1643_v6 = vpop.f32.mrb[17].mxu1 }
 0x2a5   :  { %v4319_v19 = vadd.f32 %v4191_v36, %v1643_v6 }
 0x2a6   :  { %v1812_v47 = vsel %vm1760_vm4, %v4316_v31, 0.0  ;;  %v1874_v28 = vmul.f32 %v4316_v31, %v4316_v31 }
 0x2a7   :  { %1813 = vadd.xlane.f32.xlu1 %v1812_v47  ;;  %v1809_v32 = vsel %vm1760_vm4, %v4319_v19, 0.0  ;;  %v1873_v23 = vmul.f32 %v4319_v19, %v4319_v19 }
 0x2a8   :  { %1810 = vadd.xlane.f32.xlu0 %v1809_v32  ;;  %v1940_v50 = vsel %vm1760_vm4, %v1874_v28, 0.0 }
 0x2a9   :  { %v1937_v60 = vsel %vm1760_vm4, %v1873_v23, 0.0 }
 0x2ab   :  { %1941 = vadd.xlane.f32.xlu1 %v1940_v50  ;;  %v3009_v4 = vpop.f32.mrb[18].mxu1 }
 0x2ac   :  { %v4332_v61 = vadd.f32 %v3009_v4, %v4191_v36  ;;  %1938 = vadd.xlane.f32.xlu0 %v1937_v60  ;;  %v1653_v21 = vpop.f32.mrb[19].mxu1 }
 0x2ad   :  { %v4335_v29 = vadd.f32 %v4191_v36, %v1653_v21 }
 0x2ae   :  { %v1818_v57 = vsel %vm1760_vm4, %v4332_v61, 0.0  ;;  %v1876_v9 = vmul.f32 %v4332_v61, %v4332_v61 }
 0x2af   :  { %1819 = vadd.xlane.f32.xlu1 %v1818_v57  ;;  %v1815_v30 = vsel %vm1760_vm4, %v4335_v29, 0.0  ;;  %v1875_v55 = vmul.f32 %v4335_v29, %v4335_v29 }
 0x2b0   :  { %1816 = vadd.xlane.f32.xlu0 %v1815_v30  ;;  %v1946_v39 = vsel %vm1760_vm4, %v1876_v9, 0.0 }
 0x2b1   :  { %v1943_v38 = vsel %vm1760_vm4, %v1875_v55, 0.0 }
 0x2b3   :  { %1947 = vadd.xlane.f32.xlu1 %v1946_v39  ;;  %v3012_v37 = vpop.f32.mrb[20].mxu1 }
 0x2b4   :  { %v4348_v41 = vadd.f32 %v3012_v37, %v4191_v36  ;;  %1944 = vadd.xlane.f32.xlu0 %v1943_v38  ;;  %v1663_v1 = vpop.f32.mrb[21].mxu1 }
 0x2b5   :  { %v4351_v8 = vadd.f32 %v4191_v36, %v1663_v1 }
 0x2b6   :  { %v1824_v34 = vsel %vm1760_vm4, %v4348_v41, 0.0  ;;  %v1878_v24 = vmul.f32 %v4348_v41, %v4348_v41 }
 0x2b7   :  { %1825 = vadd.xlane.f32.xlu1 %v1824_v34  ;;  %v1821_v49 = vsel %vm1760_vm4, %v4351_v8, 0.0  ;;  %v1877_v18 = vmul.f32 %v4351_v8, %v4351_v8 }
 0x2b8   :  { %1822 = vadd.xlane.f32.xlu0 %v1821_v49  ;;  %v1952_v52 = vsel %vm1760_vm4, %v1878_v24, 0.0 }
 0x2b9   :  { %v1949_v20 = vsel %vm1760_vm4, %v1877_v18, 0.0 }
 0x2bb   :  { %1953 = vadd.xlane.f32.xlu1 %v1952_v52  ;;  %v3015_v33 = vpop.f32.mrb[22].mxu1 }
 0x2bc   :  { %v4364_v40 = vadd.f32 %v3015_v33, %v4191_v36  ;;  %1950 = vadd.xlane.f32.xlu0 %v1949_v20  ;;  %v1673_v56 = vpop.f32.mrb[23].mxu1 }
 0x2bd   :  { %v4367_v11 = vadd.f32 %v4191_v36, %v1673_v56 }
 0x2be   :  { %v1830_v17 = vsel %vm1760_vm4, %v4364_v40, 0.0  ;;  %v1880_v12 = vmul.f32 %v4364_v40, %v4364_v40 }
 0x2bf   :  { %1831 = vadd.xlane.f32.xlu1 %v1830_v17  ;;  %v1827_v14 = vsel %vm1760_vm4, %v4367_v11, 0.0  ;;  %v1879_v62 = vmul.f32 %v4367_v11, %v4367_v11 }
 0x2c0   :  { %1828 = vadd.xlane.f32.xlu0 %v1827_v14  ;;  %v1958_v35 = vsel %vm1760_vm4, %v1880_v12, 0.0 }
 0x2c1   :  { %v1955_v51 = vsel %vm1760_vm4, %v1879_v62, 0.0 }
 0x2c3   :  { %1959 = vadd.xlane.f32.xlu1 %v1958_v35  ;;  %v3018_v15 = vpop.f32.mrb[24].mxu1 }
 0x2c4   :  { %v4380_v54 = vadd.f32 %v3018_v15, %v4191_v36  ;;  %1956 = vadd.xlane.f32.xlu0 %v1955_v51  ;;  %v1683_v45 = vpop.f32.mrb[25].mxu1 }
 0x2c5   :  { %v4383_v10 = vadd.f32 %v4191_v36, %v1683_v45  ;;  %v1871_v45 = vmul.f32 %v4309_v53, %v4309_v53 }
 0x2c6   :  { %v1836_v13 = vsel %vm1760_vm4, %v4380_v54, 0.0  ;;  %v1882_v3 = vmul.f32 %v4380_v54, %v4380_v54 }
 0x2c7   :  { %1837 = vadd.xlane.f32.xlu1 %v1836_v13  ;;  %v1833_v16 = vsel %vm1760_vm4, %v4383_v10, 0.0  ;;  %v1881_v0 = vmul.f32 %v4383_v10, %v4383_v10 }
 0x2c8   :  { %1834 = vadd.xlane.f32.xlu0 %v1833_v16  ;;  %v1964_v6 = vsel %vm1760_vm4, %v1882_v3, 0.0  ;;  %v1931_v3 = vsel %vm1760_vm4, %v1871_v45, 0.0 }
 0x2c9   :  { %v1961_v28 = vsel %vm1760_vm4, %v1881_v0, 0.0 }
 0x2cb   :  { %1965 = vadd.xlane.f32.xlu1 %v1964_v6  ;;  %v3021_v47 = vpop.f32.mrb[26].mxu1 }
 0x2cc   :  { %v4396_v32 = vadd.f32 %v3021_v47, %v4191_v36  ;;  %1962 = vadd.xlane.f32.xlu0 %v1961_v28  ;;  %v1693_v23 = vpop.f32.mrb[27].mxu1 }
 0x2cd   :  { %v4399_v50 = vadd.f32 %v4191_v36, %v1693_v23 }
 0x2ce   :  { %v1842_v4 = vsel %vm1760_vm4, %v4396_v32, 0.0  ;;  %v1884_v60 = vmul.f32 %v4396_v32, %v4396_v32 }
 0x2cf   :  { %1843 = vadd.xlane.f32.xlu1 %v1842_v4  ;;  %v1839_v21 = vsel %vm1760_vm4, %v4399_v50, 0.0  ;;  %v1883_v57 = vmul.f32 %v4399_v50, %v4399_v50 }
 0x2d0   :  { %1840 = vadd.xlane.f32.xlu0 %v1839_v21  ;;  %v1970_v9 = vsel %vm1760_vm4, %v1884_v60, 0.0 }
 0x2d1   :  { %v1967_v55 = vsel %vm1760_vm4, %v1883_v57, 0.0 }
 0x2d3   :  { %1971 = vadd.xlane.f32.xlu1 %v1970_v9  ;;  %v3024_v30 = vpop.f32.mrb[28].mxu1 }
 0x2d4   :  { %v4412_v39 = vadd.f32 %v3024_v30, %v4191_v36  ;;  %1968 = vadd.xlane.f32.xlu0 %v1967_v55  ;;  %v1703_v37 = vpop.f32.mrb[29].mxu1 }
 0x2d5   :  { %v4415_v38 = vadd.f32 %v4191_v36, %v1703_v37 }
 0x2d6   :  { %v1848_v1 = vsel %vm1760_vm4, %v4412_v39, 0.0  ;;  %v1886_v34 = vmul.f32 %v4412_v39, %v4412_v39 }
 0x2d7   :  { %4892 = vst [vmem:[#allocation8_spill] sm:$0xff] %v4415_v38  ;;  %1849 = vadd.xlane.f32.xlu1 %v1848_v1  ;;  %v1845_v24 = vsel %vm1760_vm4, %v4415_v38, 0.0  ;;  %v1885_v49 = vmul.f32 %v4415_v38, %v4415_v38 }
 0x2d8   :  { %1846 = vadd.xlane.f32.xlu0 %v1845_v24  ;;  %v1976_v18 = vsel %vm1760_vm4, %v1886_v34, 0.0 }
 0x2d9   :  { %v1973_v33 = vsel %vm1760_vm4, %v1885_v49, 0.0 }
 0x2db   :  { %1977 = vadd.xlane.f32.xlu1 %v1976_v18  ;;  %v3027_v52 = vpop.f32.mrb[30].mxu1 }
 0x2dc   :  { %v4428_v20 = vadd.f32 %v3027_v52, %v4191_v36  ;;  %1974 = vadd.xlane.f32.xlu0 %v1973_v33  ;;  %v1713_v56 = vpop.f32.mrb[31].mxu1 }
 0x2dd   :  { %v4431_v17 = vadd.f32 %v4191_v36, %v1713_v56  ;;  %v1872_v36 = vmul.f32 %v4305_v44, %v4305_v44 }
 0x2de   :  { %4893 = vst [vmem:[#allocation9_spill] sm:$0xff] %v4428_v20  ;;  %v1854_v12 = vsel %vm1760_vm4, %v4428_v20, 0.0  ;;  %v1888_v14 = vmul.f32 %v4428_v20, %v4428_v20 }
 0x2df   :  { %4894 = vst [vmem:[#allocation10_spill] sm:$0xff] %v4431_v17  ;;  %1855 = vadd.xlane.f32.xlu1 %v1854_v12  ;;  %v1851_v62 = vsel %vm1760_vm4, %v4431_v17, 0.0  ;;  %v1887_v35 = vmul.f32 %v4431_v17, %v4431_v17  ;;  %v1934_v13 = vsel %vm1760_vm4, %v1872_v36, 0.0 }
 0x2e0   :  { %1852 = vadd.xlane.f32.xlu0 %v1851_v62  ;;  %v1982_v15 = vsel %vm1760_vm4, %v1888_v14, 0.0 }
 0x2e1   :  { %v1979_v51 = vsel %vm1760_vm4, %v1887_v35, 0.0 }
 0x2e3   :  { %1983 = vadd.xlane.f32.xlu1 %v1982_v15 }
 0x2e4   :  { %1980 = vadd.xlane.f32.xlu0 %v1979_v51 }
 0x2e7   :  { %1935 = vadd.xlane.f32.xlu1 %v1934_v13 }
 0x2e8   :  { %1932 = vadd.xlane.f32.xlu0 %v1931_v3  ;;  %v4466_v3 = vld [vmem:[%s4881_s11] sm:$0x1] }
 0x2e9   :  { %4895 = vst [vmem:[#allocation11_spill] sm:$0xff] %v4466_v3  ;;  %2868 = vmatprep.mubr.msk.f32.mxu0 %vm1760_vm4, %v4466_v3 }
 0x2f5   :  { %v1766_v16 = vpop.xlane.xlu1 %1765 }
 0x2f6   :  { %v1763_v0 = vpop.xlane.xlu0 %1762  ;;  %v4449_v9 = vmul.f32 0.015625, %v1766_v16 }
 0x2f7   :  { %v4451_v30 = vmul.f32 0.015625, %v1763_v0 }
 0x2f8   :  { %v2050_v24 = vmul.f32 %v4449_v9, %v4449_v9 }
 0x2f9   :  { %v1894_v6 = vpop.xlane.xlu1 %1893  ;;  %v2049_v49 = vmul.f32 %v4451_v30, %v4451_v30 }
 0x2fa   :  { %v1891_v47 = vpop.xlane.xlu0 %1890  ;;  %v2018_v37 = vmul.f32 0.015625, %v1894_v6 }
 0x2fb   :  { %v2017_v34 = vmul.f32 0.015625, %v1891_v47 }
 0x2fc   :  { %v2082_v52 = vsub.f32 %v2018_v37, %v2050_v24 }
 0x2fd   :  { %v1772_v28 = vpop.xlane.xlu1 %1771  ;;  %v2081_v56 = vsub.f32 %v2017_v34, %v2049_v49 }
 0x2fe   :  { %v1769_v23 = vpop.xlane.xlu0 %1768  ;;  %v4457_v12 = vmul.f32 0.015625, %v1772_v28  ;;  %v2114_v15 = vmax.f32 %v2082_v52, 0.0 }
 0x2ff   :  { %v4459_v14 = vmul.f32 0.015625, %v1769_v23  ;;  %v2113_v51 = vmax.f32 %v2081_v56, 0.0 }
 0x300   :  { %v2052_v45 = vmul.f32 %v4457_v12, %v4457_v12  ;;  %v2178_v28 = vadd.f32 1e-05, %v2114_v15 }
 0x301   :  { %v1900_v4 = vpop.xlane.xlu1 %1899  ;;  %v2051_v16 = vmul.f32 %v4459_v14, %v4459_v14 }
 0x302   :  { %v1897_v60 = vpop.xlane.xlu0 %1896  ;;  %v2020_v62 = vmul.f32 0.015625, %v1900_v4  ;;  %v2177_v4 = vadd.f32 1e-05, %v2113_v51  ;;  %3188 = vrsqrt.f32 %v2178_v28 }
 0x303   :  { %v2019_v13 = vmul.f32 0.015625, %v1897_v60 }
 0x304   :  { %v2084_v0 = vsub.f32 %v2020_v62, %v2052_v45  ;;  %v61_v62 = vld [vmem:[#allocation2] sm:$0x1]  ;;  %3190 = vrsqrt.f32 %v2177_v4 }
 0x305   :  { %v1778_v21 = vpop.xlane.xlu1 %1777  ;;  %v2083_v60 = vsub.f32 %v2019_v13, %v2051_v16 }
 0x306   :  { %v1775_v57 = vpop.xlane.xlu0 %1774  ;;  %v4472_v6 = vmul.f32 0.015625, %v1778_v21  ;;  %v2116_v24 = vmax.f32 %v2084_v0, 0.0 }
 0x307   :  { %v4478_v37 = vmul.f32 0.015625, %v1775_v57  ;;  %v2115_v15 = vmax.f32 %v2083_v60, 0.0  ;;  %v3276_v57 = vmov 0  }
 0x308   :  { %v2054_v49 = vmul.f32 %v4472_v6, %v4472_v6  ;;  %3123 = vset.pattern.permute.xlu0 %v3276_v57 }
 0x309   :  { %v1906_v55 = vpop.xlane.xlu1 %1905  ;;  %v2053_v51 = vmul.f32 %v4478_v37, %v4478_v37  ;;  %2383 = vperm.xlu0 %3123, %v61_v62   ;;  %v2179_v0 = vadd.f32 1e-05, %v2115_v15 }
 0x30a   :  { %v1903_v1 = vpop.xlane.xlu0 %1902  ;;  %v2022_v34 = vmul.f32 0.015625, %v1906_v55  ;;  %v2180_v55 = vadd.f32 1e-05, %v2116_v24  ;;  %v2146_v24 = vsub.f32 %v4194_v63, %v4449_v9  ;;  %v4513_v63 = vld [vmem:[%s4879_s9] ss:$0 sm:$0xff]  ;;  %s3278_s9 = smov [#allocation3]  }
 0x30b   :  { %v2021_v52 = vmul.f32 0.015625, %v1903_v1 }
 0x30c   :  { %v2086_v45 = vsub.f32 %v2022_v34, %v2054_v49  ;;  %3192 = vrsqrt.f32 %v2180_v55  ;;  %v3189_v34 = vpop.eup %3188 }
 0x30d   :  { %v1784_v18 = vpop.xlane.xlu1 %1783  ;;  %v2085_v13 = vsub.f32 %v2021_v52, %v2053_v51  ;;  %3194 = vrsqrt.f32 %v2179_v0 }
 0x30e   :  { %v1781_v33 = vpop.xlane.xlu0 %1780  ;;  %v2118_v28 = vmax.f32 %v2086_v45, 0.0  ;;  %v4496_v49 = vmul.f32 0.015625, %v1784_v18  ;;  %v3191_v62 = vpop.eup %3190  ;;  %v2145_v45 = vsub.f32 %v4197_v7, %v4451_v30 }
 0x30f   :  { %v2117_v3 = vmax.f32 %v2085_v13, 0.0  ;;  %v4500_v51 = vmul.f32 0.015625, %v1781_v33  ;;  %v2242_v13 = vmul.f32 %v3189_v34, %v2146_v24  ;;  %v4527_v34 = vld [vmem:[%s4880_s10] ss:$0 sm:$0xff]  ;;  %s2589_s10 = sshll.u32 %s3278_s9, 4  ;;  %s2590_s10 = int_to_ptr.vmem [resolvable:$true] %s2589_s10 }
 0x310   :  { %v2182_v60 = vadd.f32 1e-05, %v2118_v28  ;;  %v2241_v18 = vmul.f32 %v3191_v62, %v2145_v45  ;;  %v2056_v28 = vmul.f32 %v4496_v49, %v4496_v49  ;;  %s3252_s12 = scalar_lea.vmem %s2590_s10, 32  ;;  %p3257_p1 = scmp.lt.s32.totalorder %s2590_s10, %s2590_s10 }
 0x311   :  { %v1912_v35 = vpop.xlane.xlu1 %1911  ;;  %v2181_v52 = vadd.f32 1e-05, %v2117_v3  ;;  %v2055_v9 = vmul.f32 %v4500_v51, %v4500_v51  ;;  %p3253_p0 = scmp.ne.s32.totalorder %s2590_s10, %s3252_s12  ;;  %p3258_p2 = scmp.lt.s32.totalorder %s3252_s12, %s3252_s12 }
 0x312   :  { %v1909_v36 = vpop.xlane.xlu0 %1908  ;;  %v2024_v57 = vmul.f32 0.015625, %v1912_v35  ;;  %3196 = vrsqrt.f32 %v2182_v60  ;;  %v2148_v60 = vsub.f32 %v4209_v25, %v4457_v12  ;;  %v2279_v62 = vmul.f32 %v4513_v63, %v2241_v18 }
 0x313   :  { %v2023_v0 = vmul.f32 0.015625, %v1909_v36  ;;  %3198 = vrsqrt.f32 %v2181_v52  ;;  %v2280_v36 = vmul.f32 %v4513_v63, %v2242_v13  ;;  %v2147_v52 = vsub.f32 %v4213_v27, %v4459_v14  ;;  %p3259_p3 = por %p3258_p2, %p3257_p1 }
 0x314   :  { %v2088_v7 = vsub.f32 %v2024_v57, %v2056_v28  ;;  %v2317_v25 = vadd.f32 %v4527_v34, %v2279_v62  ;;  %v2150_v27 = vsub.f32 %v4225_v42, %v4472_v6 }
 0x315   :  { %v4474_v47 = vpop.xlane.xlu1 %1789  ;;  %v2087_v35 = vsub.f32 %v2023_v0, %v2055_v9  ;;  %v2318_v28 = vadd.f32 %v4527_v34, %v2280_v36  ;;  %p3260_p4 = pnand %p3259_p3, %p3253_p0 }
 0x316   :  { %v4476_v23 = vpop.xlane.xlu0 %1786  ;;  %v3193_v33 = vpop.eup %3192  ;;  %v2120_v57 = vmax.f32 %v2088_v7, 0.0  ;;  %v4537_v44 = vmul.f32 0.015625, %v4474_v47 }
 0x317   :  { %v3195_v24 = vpop.eup %3194  ;;  %v2244_v45 = vmul.f32 %v3193_v33, %v2148_v60  ;;  %v2119_v0 = vmax.f32 %v2087_v35, 0.0  ;;  %v4540_v18 = vmul.f32 0.015625, %v4476_v23  ;;  %v2149_v35 = vsub.f32 %v4229_v22, %v4478_v37 }
 0x318   :  { %v2243_v13 = vmul.f32 %v3195_v24, %v2147_v52  ;;  %v2184_v14 = vadd.f32 1e-05, %v2120_v57  ;;  %v2350_v47 = vmax.f32 %v2318_v28, 0.0  ;;  %v2349_v52 = vmax.f32 %v2317_v25, 0.0 }
 0x319   :  { %v4482_v56 = vpop.xlane.xlu1 %1917  ;;  %v2282_v7 = vmul.f32 %v4513_v63, %v2244_v45  ;;  %v2183_v36 = vadd.f32 1e-05, %v2119_v0  ;;  %v2058_v42 = vmul.f32 %v4537_v44, %v4537_v44  ;;  %v2057_v6 = vmul.f32 %v4540_v18, %v4540_v18 }
 0x31a   :  { %v4484_v21 = vpop.xlane.xlu0 %1914  ;;  %v2026_v60 = vmul.f32 0.015625, %v4482_v56  ;;  %v2281_v20 = vmul.f32 %v4513_v63, %v2243_v13  ;;  %3200 = vrsqrt.f32 %v2184_v14  ;;  %v2151_v0 = vsub.f32 %v4245_v26, %v4500_v51 }
 0x31b   :  { %v2025_v23 = vmul.f32 0.015625, %v4484_v21  ;;  %v2320_v57 = vadd.f32 %v4527_v34, %v2282_v7  ;;  %v2152_v21 = vsub.f32 %v4241_v59, %v4496_v49  ;;  %3202 = vrsqrt.f32 %v2183_v36 }
 0x31c   :  { %v3197_v12 = vpop.eup %3196  ;;  %v2090_v28 = vsub.f32 %v2026_v60, %v2058_v42 }
 0x31d   :  { %v4488_v16 = vpop.xlane.xlu1 %1795  ;;  %v3199_v33 = vpop.eup %3198  ;;  %v2246_v62 = vmul.f32 %v3197_v12, %v2150_v27  ;;  %v2089_v13 = vsub.f32 %v2025_v23, %v2057_v6  ;;  %v4565_v12 = vpack.c.bf16 %v2350_v47, %v2349_v52  ;;  %v2319_v27 = vadd.f32 %v4527_v34, %v2281_v20 }
 0x31e   :  { %v4490_v1 = vpop.xlane.xlu0 %1792  ;;  %v2245_v37 = vmul.f32 %v3199_v33, %v2149_v35  ;;  %v4572_v7 = vmul.f32 0.015625, %v4488_v16  ;;  %v2352_v36 = vmax.f32 %v2320_v57, 0.0  ;;  %v2122_v60 = vmax.f32 %v2090_v28, 0.0 }
 0x31f   :  { %v2284_v14 = vmul.f32 %v4513_v63, %v2246_v62  ;;  %v4580_v47 = vmul.f32 0.015625, %v4490_v1  ;;  %v2121_v23 = vmax.f32 %v2089_v13, 0.0  ;;  %v2351_v42 = vmax.f32 %v2319_v27, 0.0 }
 0x320   :  { %v2283_v20 = vmul.f32 %v4513_v63, %v2245_v37  ;;  %v2186_v27 = vadd.f32 1e-05, %v2122_v60 }
 0x321   :  { %v4492_v53 = vpop.xlane.xlu1 %1923  ;;  %v2322_v6 = vadd.f32 %v4527_v34, %v2284_v14  ;;  %v2059_v14 = vmul.f32 %v4580_v47, %v4580_v47 }
 0x322   :  { %v4494_v4 = vpop.xlane.xlu0 %1920  ;;  %v2028_v62 = vmul.f32 0.015625, %v4492_v53  ;;  %v2321_v13 = vadd.f32 %v4527_v34, %v2283_v20 }
 0x323   :  { %v2027_v57 = vmul.f32 0.015625, %v4494_v4  ;;  %v2185_v4 = vadd.f32 1e-05, %v2121_v23  ;;  %v2354_v33 = vmax.f32 %v2322_v6, 0.0 }
 0x325   :  { %v4502_v15 = vpop.xlane.xlu1 %1801  ;;  %v2091_v1 = vsub.f32 %v2027_v57, %v2059_v14 }
 0x326   :  { %v4506_v55 = vpop.xlane.xlu0 %1798 }
 0x329   :  { %v4517_v30 = vpop.xlane.xlu1 %1929 }
 0x32a   :  { %v4519_v3 = vpop.xlane.xlu0 %1926 }
 0x32d   :  { %v4533_v9 = vpop.xlane.xlu1 %1807 }
 0x32e   :  { %v4542_v17 = vpop.xlane.xlu0 %1804 }
 0x334   :  { %v1814_v24 = vpop.xlane.xlu1 %1813 }
 0x335   :  { %v4556_v45 = vmul.f32 0.015625, %v1814_v24  ;;  %v1811_v22 = vpop.xlane.xlu0 %1810 }
 0x336   :  { %v4558_v56 = vmul.f32 0.015625, %v1811_v22  ;;  %v2060_v22 = vmul.f32 %v4572_v7, %v4572_v7 }
 0x337   :  { %v2066_v59 = vmul.f32 %v4556_v45, %v4556_v45 }
 0x338   :  { %v1942_v25 = vpop.xlane.xlu1 %1941  ;;  %v2065_v51 = vmul.f32 %v4558_v56, %v4558_v56 }
 0x339   :  { %v2034_v26 = vmul.f32 0.015625, %v1942_v25  ;;  %v1939_v49 = vpop.xlane.xlu0 %1938 }
 0x33a   :  { %v2033_v35 = vmul.f32 0.015625, %v1939_v49 }
 0x33b   :  { %v2098_v16 = vsub.f32 %v2034_v26, %v2066_v59  ;;  %v2092_v26 = vsub.f32 %v2028_v62, %v2060_v22 }
 0x33c   :  { %v2097_v24 = vsub.f32 %v2033_v35, %v2065_v51  ;;  %v1820_v52 = vpop.xlane.xlu1 %1819  ;;  %v3201_v51 = vpop.eup %3200 }
 0x33d   :  { %v2130_v25 = vmax.f32 %v2098_v16, 0.0  ;;  %v4587_v37 = vmul.f32 0.015625, %v1820_v52  ;;  %v1817_v28 = vpop.xlane.xlu0 %1816  ;;  %v4596_v52 = vpack.c.bf16 %v2352_v36, %v2351_v42  ;;  %v3203_v38 = vpop.eup %3202  ;;  %v2248_v23 = vmul.f32 %v3201_v51, %v2152_v21 }
 0x33e   :  { %v2129_v53 = vmax.f32 %v2097_v24, 0.0  ;;  %v4591_v59 = vmul.f32 0.015625, %v1817_v28  ;;  %v2124_v42 = vmax.f32 %v2092_v26, 0.0  ;;  %v2247_v28 = vmul.f32 %v3203_v38, %v2151_v0 }
 0x33f   :  { %v2194_v49 = vadd.f32 1e-05, %v2130_v25  ;;  %v2068_v24 = vmul.f32 %v4587_v37, %v4587_v37  ;;  %v2353_v25 = vmax.f32 %v2321_v13, 0.0  ;;  %v4616_v0 = vmul.f32 0.015625, %v4506_v55 }
 0x340   :  { %v2193_v35 = vadd.f32 1e-05, %v2129_v53  ;;  %v1948_v16 = vpop.xlane.xlu1 %1947  ;;  %v2067_v62 = vmul.f32 %v4591_v59, %v4591_v59  ;;  %v4607_v53 = vmul.f32 0.015625, %v4502_v15  ;;  %v2188_v38 = vadd.f32 1e-05, %v2124_v42 }
 0x341   :  { %3204 = vrsqrt.f32 %v2194_v49  ;;  %v2036_v20 = vmul.f32 0.015625, %v1948_v16  ;;  %v1945_v60 = vpop.xlane.xlu0 %1944  ;;  %v4613_v26 = vpack.c.bf16 %v2354_v33, %v2353_v25 }
 0x342   :  { %3206 = vrsqrt.f32 %v2193_v35  ;;  %v2035_v22 = vmul.f32 0.015625, %v1945_v60  ;;  %v2123_v35 = vmax.f32 %v2091_v1, 0.0  ;;  %v4621_v1 = vmul.f32 %v4607_v53, %v4607_v53 }
 0x343   :  { %v2100_v6 = vsub.f32 %v2036_v20, %v2068_v24  ;;  %3208 = vrsqrt.f32 %v2186_v27  ;;  %v2286_v24 = vmul.f32 %v4513_v63, %v2248_v23  ;;  %v2162_v23 = vsub.f32 %v4316_v31, %v4556_v45 }
 0x344   :  { %v2099_v14 = vsub.f32 %v2035_v22, %v2067_v62  ;;  %v1826_v49 = vpop.xlane.xlu1 %1825  ;;  %3210 = vrsqrt.f32 %v2185_v4  ;;  %v2285_v62 = vmul.f32 %v4513_v63, %v2247_v28  ;;  %v2187_v33 = vadd.f32 1e-05, %v2123_v35 }
 0x345   :  { %v2132_v16 = vmax.f32 %v2100_v6, 0.0  ;;  %v4609_v60 = vmul.f32 0.015625, %v1826_v49  ;;  %v1823_v21 = vpop.xlane.xlu0 %1822  ;;  %v4634_v49 = vmul.f32 %v4616_v0, %v4616_v0  ;;  %v2161_v35 = vsub.f32 %v4319_v19, %v4558_v56 }
 0x346   :  { %v2131_v13 = vmax.f32 %v2099_v14, 0.0  ;;  %v4611_v51 = vmul.f32 0.015625, %v1823_v21  ;;  %v4650_v56 = vadd.f32 %v4527_v34, %v2285_v62 }
 0x347   :  { %v2196_v15 = vadd.f32 1e-05, %v2132_v16  ;;  %v2070_v55 = vmul.f32 %v4609_v60, %v4609_v60 }
 0x348   :  { %v2195_v4 = vadd.f32 1e-05, %v2131_v13  ;;  %v1954_v20 = vpop.xlane.xlu1 %1953  ;;  %v2069_v42 = vmul.f32 %v4611_v51, %v4611_v51 }
 0x349   :  { %3212 = vrsqrt.f32 %v2196_v15  ;;  %v2038_v22 = vmul.f32 0.015625, %v1954_v20  ;;  %v1951_v25 = vpop.xlane.xlu0 %1950  ;;  %v4641_v15 = vadd.f32 %v4527_v34, %v2286_v24  ;;  %v2029_v24 = vmul.f32 0.015625, %v4519_v3 }
 0x34a   :  { %3214 = vrsqrt.f32 %v2195_v4  ;;  %v2037_v6 = vmul.f32 0.015625, %v1951_v25  ;;  %v2030_v4 = vmul.f32 0.015625, %v4517_v30 }
 0x34b   :  { %v3205_v14 = vpop.eup %3204  ;;  %v2102_v16 = vsub.f32 %v2038_v22, %v2070_v55  ;;  %3216 = vrsqrt.f32 %v2188_v38 }
 0x34c   :  { %v3207_v21 = vpop.eup %3206  ;;  %v2101_v31 = vsub.f32 %v2037_v6, %v2069_v42  ;;  %v1832_v45 = vpop.xlane.xlu1 %1831  ;;  %v2258_v13 = vmul.f32 %v3205_v14, %v2162_v23  ;;  %3218 = vrsqrt.f32 %v2187_v33  ;;  %v2164_v23 = vsub.f32 %v4332_v61, %v4587_v37 }
 0x34d   :  { %v2134_v20 = vmax.f32 %v2102_v16, 0.0  ;;  %v4644_v25 = vmul.f32 0.015625, %v1832_v45  ;;  %v1829_v27 = vpop.xlane.xlu0 %1828  ;;  %v2257_v57 = vmul.f32 %v3207_v21, %v2161_v35  ;;  %v3209_v38 = vpop.eup %3208  ;;  %v2356_v14 = vmax.f32 %v4641_v15, 0.0 }
 0x34e   :  { %v2133_v28 = vmax.f32 %v2101_v31, 0.0  ;;  %v4646_v36 = vmul.f32 0.015625, %v1829_v27  ;;  %v2296_v19 = vmul.f32 %v4513_v63, %v2258_v13  ;;  %v3211_v22 = vpop.eup %3210  ;;  %v2163_v21 = vsub.f32 %v4335_v29, %v4591_v59 }
 0x34f   :  { %v2198_v55 = vadd.f32 1e-05, %v2134_v20  ;;  %v2295_v30 = vmul.f32 %v4513_v63, %v2257_v57  ;;  %v2072_v62 = vmul.f32 %v4644_v25, %v4644_v25  ;;  %v4896_v15 = vsub.f32 %v4257_v46, %v4537_v44 }
 0x350   :  { %v2197_v42 = vadd.f32 1e-05, %v2133_v28  ;;  %v1960_v6 = vpop.xlane.xlu1 %1959  ;;  %v2334_v27 = vadd.f32 %v4527_v34, %v2296_v19  ;;  %v2071_v57 = vmul.f32 %v4646_v36, %v4646_v36  ;;  %v2094_v28 = vsub.f32 %v2030_v4, %v4621_v1 }
 0x351   :  { %3220 = vrsqrt.f32 %v2198_v55  ;;  %v2040_v33 = vmul.f32 0.015625, %v1960_v6  ;;  %v1957_v35 = vpop.xlane.xlu0 %1956  ;;  %v2333_v3 = vadd.f32 %v4527_v34, %v2295_v30  ;;  %v2250_v20 = vmul.f32 %v3209_v38, %v4896_v15 }
 0x352   :  { %3222 = vrsqrt.f32 %v2197_v42  ;;  %v2039_v16 = vmul.f32 0.015625, %v1957_v35  ;;  %v2366_v61 = vmax.f32 %v2334_v27, 0.0  ;;  %v2355_v1 = vmax.f32 %v4650_v56, 0.0 }
 0x353   :  { %v3213_v37 = vpop.eup %3212  ;;  %v2104_v31 = vsub.f32 %v2040_v33, %v2072_v62  ;;  %v2365_v45 = vmax.f32 %v2333_v3, 0.0  ;;  %v2093_v46 = vsub.f32 %v2029_v24, %v4634_v49  ;;  %v2126_v56 = vmax.f32 %v2094_v28, 0.0 }
 0x354   :  { %v3215_v13 = vpop.eup %3214  ;;  %v2103_v19 = vsub.f32 %v2039_v16, %v2071_v57  ;;  %v1838_v55 = vpop.xlane.xlu1 %1837  ;;  %v2260_v42 = vmul.f32 %v3213_v37, %v2164_v23  ;;  %v4899_v23 = vsub.f32 %v4261_v58, %v4540_v18  ;;  %v4691_v16 = vmul.f32 0.015625, %v4533_v9 }
 0x355   :  { %v2136_v4 = vmax.f32 %v2104_v31, 0.0  ;;  %v4676_v29 = vmul.f32 0.015625, %v1838_v55  ;;  %v1835_v59 = vpop.xlane.xlu0 %1834  ;;  %v3040_v6 = vpack.c.bf16 %v2366_v61, %v2365_v45  ;;  %v2259_v27 = vmul.f32 %v3215_v13, %v2163_v21  ;;  %v4678_v62 = vpop.eup %3216 }
 0x356   :  { %v2135_v44 = vmax.f32 %v2103_v19, 0.0  ;;  %v4681_v38 = vmul.f32 0.015625, %v1835_v59  ;;  %v2298_v33 = vmul.f32 %v4513_v63, %v2260_v42  ;;  %v2249_v35 = vmul.f32 %v3211_v22, %v4899_v23  ;;  %v4699_v18 = vpop.eup %3218 }
 0x357   :  { %v2200_v3 = vadd.f32 1e-05, %v2136_v4  ;;  %3042 = vmatprep.subr.msk.bf16.mxu0 %vm4671_vm5, %v3040_v6  ;;  %v2297_v57 = vmul.f32 %v4513_v63, %v2259_v27  ;;  %v2166_v49 = vsub.f32 %v4348_v41, %v4609_v60  ;;  %v2074_v22 = vmul.f32 %v4676_v29, %v4676_v29 }
 0x358   :  { %v2199_v24 = vadd.f32 1e-05, %v2135_v44  ;;  %v1966_v61 = vpop.xlane.xlu1 %1965  ;;  %3045 = vmatpush3.bf16.xpose.msk.msra.mxu0 %vm4671_vm5, %v4565_v12  ;;  %v2336_v58 = vadd.f32 %v4527_v34, %v2298_v33  ;;  %v2073_v41 = vmul.f32 %v4681_v38, %v4681_v38  ;;  %v2125_v12 = vmax.f32 %v2093_v46, 0.0 }
 0x359   :  { %3224 = vrsqrt.f32 %v2200_v3  ;;  %v2042_v37 = vmul.f32 0.015625, %v1966_v61  ;;  %v1963_v9 = vpop.xlane.xlu0 %1962  ;;  %v2335_v28 = vadd.f32 %v4527_v34, %v2297_v57  ;;  %v2165_v45 = vsub.f32 %v4351_v8, %v4611_v51 }
 0x35a   :  { %3226 = vrsqrt.f32 %v2199_v24  ;;  %v2041_v60 = vmul.f32 0.015625, %v1963_v9  ;;  %v2368_v21 = vmax.f32 %v2336_v58, 0.0  ;;  %v4708_v59 = vpack.c.bf16 %v2356_v14, %v2355_v1 }
 0x35b   :  { %v3221_v31 = vpop.eup %3220  ;;  %v2106_v13 = vsub.f32 %v2042_v37, %v2074_v22  ;;  %v2367_v15 = vmax.f32 %v2335_v28, 0.0  ;;  %v2288_v6 = vmul.f32 %v4513_v63, %v2250_v20  ;;  %v2190_v46 = vadd.f32 1e-05, %v2126_v56 }
 0x35c   :  { %v3223_v19 = vpop.eup %3222  ;;  %v2105_v55 = vsub.f32 %v2041_v60, %v2073_v41  ;;  %v1844_v42 = vpop.xlane.xlu1 %1843  ;;  %v2262_v4 = vmul.f32 %v3221_v31, %v2166_v49  ;;  %v2189_v51 = vadd.f32 1e-05, %v2125_v12  ;;  %v2287_v20 = vmul.f32 %v4513_v63, %v2249_v35 }
 0x35d   :  { %v2138_v27 = vmax.f32 %v2106_v13, 0.0  ;;  %v4711_v44 = vmul.f32 0.015625, %v1844_v42  ;;  %v1841_v33 = vpop.xlane.xlu0 %1840  ;;  %v3046_v23 = vpack.c.bf16 %v2368_v21, %v2367_v15  ;;  %v2261_v3 = vmul.f32 %v3223_v19, %v2165_v45 }
 0x35e   :  { %v2137_v57 = vmax.f32 %v2105_v55, 0.0  ;;  %v4713_v24 = vmul.f32 0.015625, %v1841_v33  ;;  %v2300_v8 = vmul.f32 %v4513_v63, %v2262_v4  ;;  %v2168_v1 = vsub.f32 %v4364_v40, %v4644_v25 }
 0x35f   :  { %v2202_v61 = vadd.f32 1e-05, %v2138_v27  ;;  %3048 = vmatprep.subr.msk.bf16.mxu0 %vm4671_vm5, %v3046_v23  ;;  %v2299_v14 = vmul.f32 %v4513_v63, %v2261_v3  ;;  %v4727_v22 = vadd.f32 %v4527_v34, %v2288_v6  ;;  %v2076_v37 = vmul.f32 %v4711_v44, %v4711_v44 }
 0x360   :  { %v2201_v49 = vadd.f32 1e-05, %v2137_v57  ;;  %v1972_v58 = vpop.xlane.xlu1 %1971  ;;  %3051 = vmatpush3.bf16.xpose.msk.msra.mxu0 %vm4671_vm5, %v4596_v52  ;;  %v2338_v56 = vadd.f32 %v4527_v34, %v2300_v8  ;;  %v2075_v40 = vmul.f32 %v4713_v24, %v4713_v24  ;;  %v2167_v60 = vsub.f32 %v4367_v11, %v4646_v36 }
 0x361   :  { %3228 = vrsqrt.f32 %v2202_v61  ;;  %v2044_v9 = vmul.f32 0.015625, %v1972_v58  ;;  %v1969_v35 = vpop.xlane.xlu0 %1968  ;;  %v2337_v28 = vadd.f32 %v4527_v34, %v2299_v14  ;;  %v2325_v12 = vadd.f32 %v4527_v34, %v2287_v20 }
 0x362   :  { %3230 = vrsqrt.f32 %v2201_v49  ;;  %v2043_v25 = vmul.f32 0.015625, %v1969_v35  ;;  %v2370_v41 = vmax.f32 %v2338_v56, 0.0  ;;  %v4738_v13 = vmul.f32 0.015625, %v4542_v17 }
 0x363   :  { %v3225_v52 = vpop.eup %3224  ;;  %v2108_v21 = vsub.f32 %v2044_v9, %v2076_v37  ;;  %v2369_v31 = vmax.f32 %v2337_v28, 0.0  ;;  %3232 = vrsqrt.f32 %v2190_v46  ;;  %v2357_v46 = vmax.f32 %v2325_v12, 0.0 }
 0x364   :  { %v3227_v45 = vpop.eup %3226  ;;  %v2107_v15 = vsub.f32 %v2043_v25, %v2075_v40  ;;  %v1850_v19 = vpop.xlane.xlu1 %1849  ;;  %v2264_v55 = vmul.f32 %v3225_v52, %v2168_v1  ;;  %3234 = vrsqrt.f32 %v2189_v51  ;;  %v2358_v57 = vmax.f32 %v4727_v22, 0.0 }
 0x365   :  { %v2140_v42 = vmax.f32 %v2108_v21, 0.0  ;;  %v4740_v4 = vmul.f32 0.015625, %v1850_v19  ;;  %v1847_v6 = vpop.xlane.xlu0 %1846  ;;  %v3052_v27 = vpack.c.bf16 %v2370_v41, %v2369_v31  ;;  %v2263_v33 = vmul.f32 %v3227_v45, %v2167_v60 }
 0x366   :  { %v2139_v11 = vmax.f32 %v2107_v15, 0.0  ;;  %v4742_v36 = vmul.f32 0.015625, %v1847_v6  ;;  %v2302_v23 = vmul.f32 %v4513_v63, %v2264_v55  ;;  %v4900_v8 = vsub.f32 %v4273_v5, %v4572_v7 }
 0x367   :  { %v2204_v3 = vadd.f32 1e-05, %v2140_v42  ;;  %3054 = vmatprep.subr.msk.bf16.mxu0 %vm4671_vm5, %v3052_v27  ;;  %v2301_v17 = vmul.f32 %v4513_v63, %v2263_v33  ;;  %v2170_v51 = vsub.f32 %v4380_v54, %v4676_v29  ;;  %v2078_v49 = vmul.f32 %v4740_v4, %v4740_v4 }
 0x368   :  { %v2252_v61 = vmul.f32 %v4678_v62, %v4900_v8  ;;  %v2203_v14 = vadd.f32 1e-05, %v2139_v11  ;;  %v1978_v20 = vpop.xlane.xlu1 %1977  ;;  %3057 = vmatpush3.bf16.xpose.msk.msra.mxu0 %vm4671_vm5, %v4613_v26  ;;  %v2340_v1 = vadd.f32 %v4527_v34, %v2302_v23  ;;  %v2077_v54 = vmul.f32 %v4742_v36, %v4742_v36 }
 0x369   :  { %3236 = vrsqrt.f32 %v2204_v3  ;;  %v2046_v58 = vmul.f32 0.015625, %v1978_v20  ;;  %v1975_v56 = vpop.xlane.xlu0 %1974  ;;  %v2339_v5 = vadd.f32 %v4527_v34, %v2301_v17  ;;  %v4901_v26 = vsub.f32 %v4277_v2, %v4580_v47 }
 0x36a   :  { %3238 = vrsqrt.f32 %v2203_v14  ;;  %v2045_v7 = vmul.f32 0.015625, %v1975_v56  ;;  %v2372_v29 = vmax.f32 %v2340_v1, 0.0  ;;  %v2169_v37 = vsub.f32 %v4383_v10, %v4681_v38 }
 0x36b   :  { %v3229_v62 = vpop.eup %3228  ;;  %v2251_v22 = vmul.f32 %v4699_v18, %v4901_v26  ;;  %v2110_v9 = vsub.f32 %v2046_v58, %v2078_v49  ;;  %v2371_v35 = vmax.f32 %v2339_v5, 0.0  ;;  %v4772_v40 = vmul.f32 %v4691_v16, %v4691_v16 }
 0x36c   :  { %v3231_v28 = vpop.eup %3230  ;;  %v2109_v25 = vsub.f32 %v2045_v7, %v2077_v54  ;;  %v1856_v41 = vpop.xlane.xlu1 %1855  ;;  %v2266_v52 = vmul.f32 %v3229_v62, %v2170_v51  ;;  %v2290_v60 = vmul.f32 %v4513_v63, %v2252_v61  ;;  %v2063_v10 = vmul.f32 %v4738_v13, %v4738_v13 }
 0x36d   :  { %v2142_v21 = vmax.f32 %v2110_v9, 0.0  ;;  %v4775_v31 = vmul.f32 0.015625, %v1856_v41  ;;  %v1853_v2 = vpop.xlane.xlu0 %1852  ;;  %v3058_v47 = vpack.c.bf16 %v2372_v29, %v2371_v35  ;;  %v2265_v18 = vmul.f32 %v3231_v28, %v2169_v37  ;;  %v3233_v12 = vpop.eup %3232 }
 0x36e   :  { %v2141_v38 = vmax.f32 %v2109_v25, 0.0  ;;  %v4779_v45 = vmul.f32 0.015625, %v1853_v2  ;;  %v2304_v15 = vmul.f32 %v4513_v63, %v2266_v52  ;;  %v3067_v42 = vpack.c.bf16 %v2358_v57, %v2357_v46  ;;  %v3235_v27 = vpop.eup %3234 }
 0x36f   :  { %v2206_v19 = vadd.f32 1e-05, %v2142_v21  ;;  %3060 = vmatprep.subr.msk.bf16.mxu0 %vm4671_vm5, %v3058_v47  ;;  %v2303_v55 = vmul.f32 %v4513_v63, %v2265_v18  ;;  %v2289_v6 = vmul.f32 %v4513_v63, %v2251_v22  ;;  %v2172_v33 = vsub.f32 %v4396_v32, %v4711_v44 }
 0x370   :  { %v2205_v11 = vadd.f32 1e-05, %v2141_v38  ;;  %v1984_v23 = vpop.xlane.xlu1 %1983  ;;  %3063 = vmatpush3.bf16.xpose.msk.msra.mxu0 %vm4671_vm5, %v4708_v59  ;;  %v2342_v3 = vadd.f32 %v4527_v34, %v2304_v15  ;;  %v2328_v17 = vadd.f32 %v4527_v34, %v2290_v60  ;;  %v2080_v46 = vmul.f32 %v4775_v31, %v4775_v31 }
 0x371   :  { %3240 = vrsqrt.f32 %v2206_v19  ;;  %v2048_v57 = vmul.f32 0.015625, %v1984_v23  ;;  %v1981_v8 = vpop.xlane.xlu0 %1980  ;;  %v2341_v61 = vadd.f32 %v4527_v34, %v2303_v55  ;;  %v2079_v32 = vmul.f32 %v4779_v45, %v4779_v45  ;;  %v4904_v19 = vld [vmem:[#allocation8_spill] sm:$0xff] }
 0x372   :  { %3242 = vrsqrt.f32 %v2205_v11  ;;  %v2047_v44 = vmul.f32 0.015625, %v1981_v8  ;;  %v2374_v51 = vmax.f32 %v2342_v3, 0.0  ;;  %v2171_v59 = vsub.f32 %v4399_v50, %v4713_v24 }
 0x373   :  { %v3237_v14 = vpop.eup %3236  ;;  %v2112_v20 = vsub.f32 %v2048_v57, %v2080_v46  ;;  %v2373_v1 = vmax.f32 %v2341_v61, 0.0  ;;  %v2327_v49 = vadd.f32 %v4527_v34, %v2289_v6  ;;  %v4902_v56 = vsub.f32 %v4289_v48, %v4607_v53  ;;  %v4905_v61 = vld [vmem:[#allocation9_spill] sm:$0xff] }
 0x374   :  { %v3239_v58 = vpop.eup %3238  ;;  %v4903_v54 = vsub.f32 %v4293_v43, %v4616_v0  ;;  %v2111_v29 = vsub.f32 %v2047_v44, %v2079_v32  ;;  %v1936_v62 = vpop.xlane.xlu1 %1935  ;;  %v2268_v26 = vmul.f32 %v3237_v14, %v2172_v33  ;;  %v2360_v41 = vmax.f32 %v2328_v17, 0.0 }
 0x375   :  { %v2254_v5 = vmul.f32 %v3233_v12, %v4902_v56  ;;  %v2144_v22 = vmax.f32 %v2112_v20, 0.0  ;;  %v2032_v37 = vmul.f32 0.015625, %v1936_v62  ;;  %v1933_v9 = vpop.xlane.xlu0 %1932  ;;  %v3064_v50 = vpack.c.bf16 %v2374_v51, %v2373_v1  ;;  %v4906_v20 = vld [vmem:[#allocation10_spill] sm:$0xff] }
 0x376   :  { %v2253_v7 = vmul.f32 %v3235_v27, %v4903_v54  ;;  %v2267_v24 = vmul.f32 %v3239_v58, %v2171_v59  ;;  %v2143_v35 = vmax.f32 %v2111_v29, 0.0  ;;  %v2031_v28 = vmul.f32 0.015625, %v1933_v9 }
 0x377   :  { %v2306_v25 = vmul.f32 %v4513_v63, %v2268_v26  ;;  %v2208_v52 = vadd.f32 1e-05, %v2144_v22  ;;  %v2096_v48 = vsub.f32 %v2032_v37, %v4772_v40  ;;  %3066 = vmatprep.subr.msk.bf16.mxu0 %vm4671_vm5, %v3064_v50  ;;  %v2359_v53 = vmax.f32 %v2327_v49, 0.0 }
 0x378   :  { %v2305_v43 = vmul.f32 %v4513_v63, %v2267_v24  ;;  %v2207_v0 = vadd.f32 1e-05, %v2143_v35  ;;  %v2095_v60 = vsub.f32 %v2031_v28, %v2063_v10  ;;  %3069 = vmatpush3.bf16.xpose.msk.msra.mxu0 %vm4671_vm5, %v3067_v42  ;;  %v2292_v2 = vmul.f32 %v4513_v63, %v2254_v5 }
 0x379   :  { %v2344_v21 = vadd.f32 %v4527_v34, %v2306_v25  ;;  %3244 = vrsqrt.f32 %v2208_v52  ;;  %v2128_v47 = vmax.f32 %v2096_v48, 0.0  ;;  %v2291_v40 = vmul.f32 %v4513_v63, %v2253_v7  ;;  %v4907_v7 = vld [vmem:[#allocation6_spill] sm:$0xff] }
 0x37a   :  { %v2343_v18 = vadd.f32 %v4527_v34, %v2305_v43  ;;  %v2174_v12 = vsub.f32 %v4412_v39, %v4740_v4  ;;  %3246 = vrsqrt.f32 %v2207_v0  ;;  %v2127_v38 = vmax.f32 %v2095_v60, 0.0 }
 0x37b   :  { %v2376_v15 = vmax.f32 %v2344_v21, 0.0  ;;  %v3241_v10 = vpop.eup %3240  ;;  %v2173_v55 = vsub.f32 %v4904_v19, %v4742_v36  ;;  %v2192_v42 = vadd.f32 1e-05, %v2128_v47  ;;  %v3073_v3 = vpack.c.bf16 %v2360_v41, %v2359_v53  ;;  %v4909_v21 = vld [vmem:[#allocation11_spill] sm:$0xff] }
 0x37c   :  { %v2375_v6 = vmax.f32 %v2343_v18, 0.0  ;;  %v3243_v27 = vpop.eup %3242  ;;  %v2191_v33 = vadd.f32 1e-05, %v2127_v38  ;;  %v2270_v11 = vmul.f32 %v3241_v10, %v2174_v12  ;;  %v2329_v39 = vadd.f32 %v4527_v34, %v2291_v40 }
 0x37d   :  { %3248 = vrsqrt.f32 %v2192_v42  ;;  %v2269_v17 = vmul.f32 %v3243_v27, %v2173_v55  ;;  %v2330_v4 = vadd.f32 %v4527_v34, %v2292_v2  ;;  %v2176_v32 = vsub.f32 %v4905_v61, %v4775_v31  ;;  %v4908_v31 = vld [vmem:[#allocation7_spill] sm:$0xff] }
 0x37e   :  { %v3070_v23 = vpack.c.bf16 %v2376_v15, %v2375_v6  ;;  %3250 = vrsqrt.f32 %v2191_v33  ;;  %v2308_v46 = vmul.f32 %v4513_v63, %v2270_v11  ;;  %v2361_v51 = vmax.f32 %v2329_v39, 0.0 }
 0x37f   :  { %v2307_v36 = vmul.f32 %v4513_v63, %v2269_v17  ;;  %v2362_v14 = vmax.f32 %v2330_v4, 0.0  ;;  %v2175_v1 = vsub.f32 %v4906_v20, %v4779_v45  ;;  %v2160_v29 = vsub.f32 %v4907_v7, %v4691_v16 }
 0x380   :  { %3072 = vmatprep.subr.msk.bf16.mxu0 %vm4671_vm5, %v3070_v23  ;;  %v2346_v57 = vadd.f32 %v4527_v34, %v2308_v46  ;;  %v2159_v37 = vsub.f32 %v4908_v31, %v4738_v13  ;;  %v2386_v2 = vlaneseq  ;;  %v3277_v40 = vmov 1966171168  }
 0x381   :  { %3075 = vmatpush3.bf16.xpose.msk.msra.mxu0 %vm4671_vm5, %v3073_v3  ;;  %v2345_v8 = vadd.f32 %v4527_v34, %v2307_v36  ;;  %v3079_v62 = vpack.c.bf16 %v2362_v14, %v2361_v51  ;;  %v2564_v12 = vunpack.c.l.s4 %v3277_v40 }
 0x382   :  { %v2378_v44 = vmax.f32 %v2346_v57, 0.0  ;;  %v2387_v47 = vshrl.u32 %v2386_v2, 7  ;;  %vm2580_vm6 = vcmp.lt.s32.totalorder %v2386_v2, 256 }
 0x383   :  { %v3245_v59 = vpop.eup %3244  ;;  %v2377_v49 = vmax.f32 %v2345_v8, 0.0 }
 0x384   :  { %v3247_v58 = vpop.eup %3246  ;;  %v2272_v56 = vmul.f32 %v3245_v59, %v2176_v32 }
 0x385   :  { %v3076_v5 = vpack.c.bf16 %v2378_v44, %v2377_v49  ;;  %v2271_v54 = vmul.f32 %v3247_v58, %v2175_v1 }
 0x386   :  { %v2310_v26 = vmul.f32 %v4513_v63, %v2272_v56 }
 0x387   :  { %v3249_v22 = vpop.eup %3248  ;;  %3078 = vmatprep.subr.msk.bf16.mxu0 %vm4671_vm5, %v3076_v5  ;;  %v2309_v45 = vmul.f32 %v4513_v63, %v2271_v54 }
 0x388   :  { %v3251_v9 = vpop.eup %3250  ;;  %v2256_v50 = vmul.f32 %v3249_v22, %v2160_v29  ;;  %v2348_v24 = vadd.f32 %v4527_v34, %v2310_v26  ;;  %v2384_v18 = vpop.permute.xlu0 %2383 }
 0x389   :  { %3081 = vmatpush3.bf16.xpose.msk.msra.mxu0 %vm4671_vm5, %v3079_v62  ;;  %v2255_v16 = vmul.f32 %v3251_v9, %v2159_v37  ;;  %v2347_v35 = vadd.f32 %v4527_v34, %v2309_v45 }
 0x38a   :  { %v2294_v28 = vmul.f32 %v4513_v63, %v2256_v50  ;;  %v2380_v25 = vmax.f32 %v2348_v24, 0.0 }
 0x38b   :  { %v2379_v41 = vmax.f32 %v2347_v35, 0.0  ;;  %v2293_v13 = vmul.f32 %v4513_v63, %v2255_v16  ;;  %v2388_v63 = vsub.s32 0, %v2387_v47 }
 0x38c   :  { %v2332_v52 = vadd.f32 %v4527_v34, %v2294_v28 }
 0x38d   :  { %v3082_v48 = vpack.c.bf16 %v2380_v25, %v2379_v41  ;;  %v2331_v43 = vadd.f32 %v4527_v34, %v2293_v13  ;;  %v2389_v38 = vrot.slane %v2384_v18, %v2388_v63  ;;  %v2565_v34 = vunpack.c.0.s8 %v2564_v12 }
 0x38e   :  { %v2364_v53 = vmax.f32 %v2332_v52, 0.0 }
 0x38f   :  { %3084 = vmatprep.subr.msk.bf16.mxu0 %vm4671_vm5, %v3082_v48  ;;  %v2363_v0 = vmax.f32 %v2331_v43, 0.0  ;;  %v2568_v42 = vsub.s32 %v2565_v34, %v2387_v47 }
 0x391   :  { %v3085_v60 = vpack.c.bf16 %v2364_v53, %v2363_v0 }
 0x393   :  { %3087 = vmatpush3.bf16.xpose.msk.msra.mxu0 %vm4671_vm5, %v3085_v60 }
 0x39a   :  { %2869 = vmatmul.mubr.msk.f32.vlgmr.msra.gmra.mrb[32].mxu0 %vm1760_vm4, %v4909_v21 }
 0x46d   :  { %v2555_v15 = vpop.f32.mrb[32].mxu0 }
 0x46e   :  { %v2556_v10 = vadd.f32 %v2555_v15, %v2389_v38  ;;  %v2557_v19 = vpop.f32.mrb[33].mxu0 }
 0x46f   :  { %v2558_v55 = vadd.f32 %v2557_v19, %v2389_v38 }
 0x471   :  { %v2562_v6 = vcombine.low %v2556_v10, %v2558_v55 }
 0x473   :  { %v2569_v30 = vrot.slane %v2562_v6, %v2568_v42 }
 0x475   :  { %v2576_v27 = vrot.slane %v2569_v30, %v2568_v42 }
 0x477   :  { %2582 = vst.msk [vmem:[#allocation3] sm:$0x3] %vm2580_vm6, %v2576_v27 }
 0x478   :  { %3263 = shalt.err (!%p3260_p4)
}
 0x479   :  { %s3264_s18 = scalar_lea.hbm %s4883_s13, 32 }
 0x47a   :  { %p3265_p5 = scmp.ne.s32.totalorder %s4883_s13, %s3264_s18  ;;  %p3268_p6 = scmp.lt.u32.totalorder %s3264_s18, %s4883_s13 }
 0x47c   :  { %p3270_p7 = pnand %p3268_p6, %p3265_p5 }
 0x47e   :  { %3273 = shalt.err (!%p3270_p7)
}
 0x47f   :  { %2592 = dma.vmem_to_hbm [thread:$0]  %s2590_s10, 32, %s4883_s13, [#allocation4]  }
 0x480   :  { %3274 = dma.done.wait [#allocation4], 32  }
 0x481   :  { %3275 = vsyncadd [#allocation4], 4294967264 }
 0x482   :  { %2596 = vsyncpa [#allocation4], 1 }

</bundles_post_ra>
